<compile_context>
chip_gen: v5e
topology: v5e:2x2
jax: 0.10.0
libtpu: 0.0.40
codegen_flags: <defaults>
</compile_context>

<pallas_src>
import jax
import jax.numpy as jnp
from jax.experimental import pallas as pl
from jax.experimental.pallas import tpu as pltpu

BN_EPS = 1e-5
H1, H2, C = 100, 50, 10        # logical layer widths (PyTorch module)
H1P, H2P, CP = 128, 128, 128   # lane-padded widths (multiples of 128)


def secondnet_kernel(x_ref,
                     w0_ref, aux0_ref,
                     w1_ref, aux1_ref,
                     w2_ref, b2_ref,
                     o_ref):
    """Whole forward pass for one batch, everything resident in VMEM."""
    x = x_ref[...]                                       # [B, Fpad] bf16

    def batchnorm(h, gamma, beta):
        # Training-mode BatchNorm1d (biased batch stats), single pass:
        # var = E[h^2] - mean^2 ; gamma folded into scale, beta into shift.
        mean = jnp.mean(h, axis=0, keepdims=True)
        var = jnp.maximum(jnp.mean(h * h, axis=0, keepdims=True) - mean * mean, 0.0)
        scale = gamma * jax.lax.rsqrt(var + BN_EPS)      # padded gamma==0 -> scale 0
        shift = beta - mean * scale
        return h * scale + shift

    # Packed per-layer aux slabs: row 0 = bias, row 1 = gamma, row 2 = beta.
    b0, g1, be1 = aux0_ref[0:1, :], aux0_ref[1:2, :], aux0_ref[2:3, :]
    b1, g2, be2 = aux1_ref[0:1, :], aux1_ref[1:2, :], aux1_ref[2:3, :]

    # fc0 -> relu -> bn1   (bf16 into the MXU, f32 accumulate / elementwise)
    h = jnp.dot(x, w0_ref[...], preferred_element_type=jnp.float32) + b0
    h = jnp.maximum(h, 0.0)
    h = batchnorm(h, g1, be1)

    # fc1 -> relu -> bn2
    h = jnp.dot(h.astype(jnp.bfloat16), w1_ref[...],
                preferred_element_type=jnp.float32) + b1
    h = jnp.maximum(h, 0.0)
    h = batchnorm(h, g2, be2)

    # fc2 -> relu
    h = jnp.dot(h.astype(jnp.bfloat16), w2_ref[...],
                preferred_element_type=jnp.float32) + b2_ref[...]
    h = jnp.maximum(h, 0.0)

    # Mask padded class lanes so they don't leak into the softmax normalizer.
    lane = jax.lax.broadcasted_iota(jnp.int32, h.shape, 1)
    h = jnp.where(lane < C, h, -1e30)

    # log_softmax along class dim (dim=1); store full lane-dense [B, 128] slab.
    m = jnp.max(h, axis=1, keepdims=True)
    lse = jnp.log(jnp.sum(jnp.exp(h - m), axis=1, keepdims=True)) + m
    o_ref[...] = (h - lse).astype(o_ref.dtype)


def init_params(key, image_size):
    """Deterministic synthetic params at the LOGICAL PyTorch sizes.
    Linear: U(-1/sqrt(fan_in), 1/sqrt(fan_in)) like PyTorch; BN gamma/beta are
    randomized (instead of 1/0) to exercise the math."""
    ks = jax.random.split(key, 8)

    def lin(kw, kb, fan_in, fan_out):
        bound = 1.0 / jnp.sqrt(float(fan_in))
        w = jax.random.uniform(kw, (fan_in, fan_out), jnp.float32, -bound, bound)
        b = jax.random.uniform(kb, (fan_out,), jnp.float32, -bound, bound)
        return w, b

    w0, b0 = lin(ks[0], ks[1], image_size, H1)
    w1, b1 = lin(ks[2], ks[3], H1, H2)
    w2, b2 = lin(ks[4], ks[5], H2, C)
    g1 = 1.0 + 0.1 * jax.random.normal(ks[6], (H1,), jnp.float32)
    be1 = 0.1 * jax.random.normal(ks[7], (H1,), jnp.float32)
    g2 = 1.0 + 0.1 * jax.random.normal(jax.random.fold_in(key, 100), (H2,), jnp.float32)
    be2 = 0.1 * jax.random.normal(jax.random.fold_in(key, 101), (H2,), jnp.float32)
    return dict(w0=w0, b0=b0, g1=g1, be1=be1,
                w1=w1, b1=b1, g2=g2, be2=be2,
                w2=w2, b2=b2)


def _pad2(w, rows, cols, dtype):
    out = jnp.zeros((rows, cols), dtype)
    return out.at[:w.shape[0], :w.shape[1]].set(w.astype(dtype))


def _pack_aux(rows, cols):
    """Stack 1-D vectors into a zero-padded [len(rows), cols] f32 slab."""
    out = jnp.zeros((len(rows), cols), jnp.float32)
    for i, v in enumerate(rows):
        out = out.at[i, :v.shape[0]].set(v)
    return out


def pad_params(p, image_size):
    """Zero-pad everything to 128-lane widths; weights stored bf16 for the MXU.
    gamma/beta pads are 0 so padded columns are forced to exactly 0 by BN."""
    fpad = ((image_size + 127) // 128) * 128
    return dict(
        w0=_pad2(p["w0"], fpad, H1P, jnp.bfloat16),
        aux0=_pack_aux([p["b0"], p["g1"], p["be1"]], H1P),   # bias / gamma / beta
        w1=_pad2(p["w1"], H1P, H2P, jnp.bfloat16),
        aux1=_pack_aux([p["b1"], p["g2"], p["be2"]], H2P),
        w2=_pad2(p["w2"], H2P, CP, jnp.bfloat16),
        b2=_pack_aux([p["b2"]], CP),
    )


def secondnet_forward(x, pp, image_size):
    # Glue: NCHW -> [B, image_size] flatten (mirrors x.view(-1, image_size)).
    # Cast to bf16 here: MXU-native dtype and half the input DMA bytes.
    xb = x.reshape(-1, image_size).astype(jnp.bfloat16)
    B = xb.shape[0]
    fpad = ((image_size + 127) // 128) * 128
    if fpad != image_size:
        xb = jnp.pad(xb, ((0, 0), (0, fpad - image_size)))   # zero feature pad

    args = (xb, pp["w0"], pp["aux0"], pp["w1"], pp["aux1"], pp["w2"], pp["b2"])

    vmem = pl.BlockSpec(memory_space=pltpu.MemorySpace.VMEM)

    flops = 2 * B * (fpad * H1P + H1P * H2P + H2P * CP)
    bytes_accessed = int(sum(a.size * a.dtype.itemsize for a in args) + B * CP * 4)
    cost = pl.CostEstimate(flops=flops,
                           transcendentals=B * CP + B + H1P + H2P,
                           bytes_accessed=bytes_accessed)

    out_pad = pl.pallas_call(
        secondnet_kernel,
        out_shape=jax.ShapeDtypeStruct((B, CP), jnp.float32),
        in_specs=[vmem] * len(args),
        out_specs=vmem,
        cost_estimate=cost,
    )(*args)
    return out_pad[:, :C]   # drop padded class lanes in the (free) wrapper slice


def secondnet_ref(x, pp, image_size):
    """Pure-JAX reference with the identical padded/bf16 math (for checking)."""
    xb = x.reshape(-1, image_size).astype(jnp.bfloat16)
    fpad = ((image_size + 127) // 128) * 128
    if fpad != image_size:
        xb = jnp.pad(xb, ((0, 0), (0, fpad - image_size)))

    def bn(h, gamma, beta):
        mean = jnp.mean(h, axis=0, keepdims=True)
        var = jnp.maximum(jnp.mean(h * h, axis=0, keepdims=True) - mean * mean, 0.0)
        scale = gamma * jax.lax.rsqrt(var + BN_EPS)
        return h * scale + (beta - mean * scale)

    b0, g1, be1 = pp["aux0"][0:1], pp["aux0"][1:2], pp["aux0"][2:3]
    b1, g2, be2 = pp["aux1"][0:1], pp["aux1"][1:2], pp["aux1"][2:3]

    h = jnp.dot(xb, pp["w0"], preferred_element_type=jnp.float32) + b0
    h = bn(jnp.maximum(h, 0.0), g1, be1)
    h = jnp.dot(h.astype(jnp.bfloat16), pp["w1"], preferred_element_type=jnp.float32) + b1
    h = bn(jnp.maximum(h, 0.0), g2, be2)
    h = jnp.dot(h.astype(jnp.bfloat16), pp["w2"], preferred_element_type=jnp.float32) + pp["b2"]
    h = jnp.maximum(h, 0.0)
    lane = jax.lax.broadcasted_iota(jnp.int32, h.shape, 1)
    h = jnp.where(lane < C, h, -1e30)
    m = jnp.max(h, axis=1, keepdims=True)
    lse = jnp.log(jnp.sum(jnp.exp(h - m), axis=1, keepdims=True)) + m
    return (h - lse)[:, :C]


if __name__ == "__main__":
    IMAGE_SIZE = 16 * 16   # small "Fashion-MNIST-like" image: 16x16, 1 channel
    BATCH = 128            # >= 128 rows per call: fills MXU sublanes, amortizes launch

    key = jax.random.PRNGKey(0)
    k_x, k_p = jax.random.split(key)
    x = jax.random.normal(k_x, (BATCH, 1, 16, 16), jnp.float32)   # NCHW input
    params = init_params(k_p, IMAGE_SIZE)
    pp = pad_params(params, IMAGE_SIZE)

    out = secondnet_forward(x, pp, IMAGE_SIZE)
    out = jax.block_until_ready(out)

    assert out.shape == (BATCH, C)
    # sanity: rows of log_softmax exponentiate-sum to ~1
    assert bool(jnp.allclose(jnp.exp(out).sum(axis=1), 1.0, atol=1e-4))
    # kernel matches pure-JAX reference with identical padded/bf16 math
    ref = secondnet_ref(x, pp, IMAGE_SIZE)
    assert bool(jnp.allclose(out, ref, atol=5e-3, rtol=5e-3)), \
        float(jnp.max(jnp.abs(out - ref)))
    print("KERNEL_OK")
</pallas_src>

<mosaic_0001>
module attributes {stable_mosaic.version = 11 : i64} {
  func.func @secondnet_kernel(%arg0: memref<128x256xbf16, #tpu.memory_space<vmem>>, %arg1: memref<256x128xbf16, #tpu.memory_space<vmem>>, %arg2: memref<3x128xf32, #tpu.memory_space<vmem>>, %arg3: memref<128x128xbf16, #tpu.memory_space<vmem>>, %arg4: memref<3x128xf32, #tpu.memory_space<vmem>>, %arg5: memref<128x128xbf16, #tpu.memory_space<vmem>>, %arg6: memref<1x128xf32, #tpu.memory_space<vmem>>, %arg7: memref<128x128xf32, #tpu.memory_space<vmem>>) attributes {dimension_semantics = [], scalar_prefetch = 0 : i64, scratch_operands = 0 : i64, tpu.core_type = #tpu.core_type<tc>} {
    %c0 = arith.constant 0 : index
    %c0_0 = arith.constant 0 : index
    %0 = vector.load %arg0[%c0, %c0_0] : memref<128x256xbf16, #tpu.memory_space<vmem>>, vector<128x256xbf16>
    %c0_1 = arith.constant 0 : index
    %c0_2 = arith.constant 0 : index
    %1 = vector.load %arg2[%c0_1, %c0_2] : memref<3x128xf32, #tpu.memory_space<vmem>>, vector<1x128xf32>
    %c1 = arith.constant 1 : index
    %c0_3 = arith.constant 0 : index
    %2 = vector.load %arg2[%c1, %c0_3] : memref<3x128xf32, #tpu.memory_space<vmem>>, vector<1x128xf32>
    %c2 = arith.constant 2 : index
    %c0_4 = arith.constant 0 : index
    %3 = vector.load %arg2[%c2, %c0_4] : memref<3x128xf32, #tpu.memory_space<vmem>>, vector<1x128xf32>
    %c0_5 = arith.constant 0 : index
    %c0_6 = arith.constant 0 : index
    %4 = vector.load %arg4[%c0_5, %c0_6] : memref<3x128xf32, #tpu.memory_space<vmem>>, vector<1x128xf32>
    %c1_7 = arith.constant 1 : index
    %c0_8 = arith.constant 0 : index
    %5 = vector.load %arg4[%c1_7, %c0_8] : memref<3x128xf32, #tpu.memory_space<vmem>>, vector<1x128xf32>
    %c2_9 = arith.constant 2 : index
    %c0_10 = arith.constant 0 : index
    %6 = vector.load %arg4[%c2_9, %c0_10] : memref<3x128xf32, #tpu.memory_space<vmem>>, vector<1x128xf32>
    %c0_11 = arith.constant 0 : index
    %c0_12 = arith.constant 0 : index
    %7 = vector.load %arg1[%c0_11, %c0_12] : memref<256x128xbf16, #tpu.memory_space<vmem>>, vector<256x128xbf16>
    %cst = arith.constant dense<0.000000e+00> : vector<128x128xf32>
    %8 = tpu.matmul %0, %7, %cst {dimension_numbers = #tpu.dot_dimension_numbers<[1], [0], [0], [1], [0, 0, 1, 1], [], []>} : vector<128x256xbf16>, vector<256x128xbf16>, vector<128x128xf32> -> vector<128x128xf32>
    %9 = vector.broadcast %1 : vector<1x128xf32> to vector<128x128xf32>
    %10 = arith.addf %8, %9 : vector<128x128xf32>
    %cst_13 = arith.constant 0.000000e+00 : f32
    %11 = vector.broadcast %cst_13 : f32 to vector<128x128xf32>
    %12 = arith.maximumf %10, %11 : vector<128x128xf32>
    %cst_14 = arith.constant dense<0.000000e+00> : vector<128xf32>
    %13 = vector.multi_reduction <add>, %12, %cst_14 [0] : vector<128x128xf32> to vector<128xf32>
    %14 = vector.shape_cast %13 : vector<128xf32> to vector<1x128xf32>
    %cst_15 = arith.constant 1.280000e+02 : f32
    %15 = vector.broadcast %cst_15 : f32 to vector<1x128xf32>
    %16 = arith.divf %14, %15 : vector<1x128xf32>
    %17 = arith.mulf %12, %12 : vector<128x128xf32>
    %cst_16 = arith.constant dense<0.000000e+00> : vector<128xf32>
    %18 = vector.multi_reduction <add>, %17, %cst_16 [0] : vector<128x128xf32> to vector<128xf32>
    %19 = vector.shape_cast %18 : vector<128xf32> to vector<1x128xf32>
    %cst_17 = arith.constant 1.280000e+02 : f32
    %20 = vector.broadcast %cst_17 : f32 to vector<1x128xf32>
    %21 = arith.divf %19, %20 : vector<1x128xf32>
    %22 = arith.mulf %16, %16 : vector<1x128xf32>
    %23 = arith.subf %21, %22 : vector<1x128xf32>
    %cst_18 = arith.constant 0.000000e+00 : f32
    %24 = vector.broadcast %cst_18 : f32 to vector<1x128xf32>
    %25 = arith.maximumf %23, %24 : vector<1x128xf32>
    %cst_19 = arith.constant 9.99999974E-6 : f32
    %26 = vector.broadcast %cst_19 : f32 to vector<1x128xf32>
    %27 = arith.addf %25, %26 : vector<1x128xf32>
    %28 = math.rsqrt %27 : vector<1x128xf32>
    %29 = arith.mulf %2, %28 : vector<1x128xf32>
    %30 = arith.mulf %16, %29 : vector<1x128xf32>
    %31 = arith.subf %3, %30 : vector<1x128xf32>
    %32 = vector.broadcast %29 : vector<1x128xf32> to vector<128x128xf32>
    %33 = arith.mulf %12, %32 : vector<128x128xf32>
    %34 = vector.broadcast %31 : vector<1x128xf32> to vector<128x128xf32>
    %35 = arith.addf %33, %34 : vector<128x128xf32>
    %36 = arith.truncf %35 : vector<128x128xf32> to vector<128x128xbf16>
    %c0_20 = arith.constant 0 : index
    %c0_21 = arith.constant 0 : index
    %37 = vector.load %arg3[%c0_20, %c0_21] : memref<128x128xbf16, #tpu.memory_space<vmem>>, vector<128x128xbf16>
    %cst_22 = arith.constant dense<0.000000e+00> : vector<128x128xf32>
    %38 = tpu.matmul %36, %37, %cst_22 {dimension_numbers = #tpu.dot_dimension_numbers<[1], [0], [0], [1], [0, 0, 1, 1], [], []>} : vector<128x128xbf16>, vector<128x128xbf16>, vector<128x128xf32> -> vector<128x128xf32>
    %39 = vector.broadcast %4 : vector<1x128xf32> to vector<128x128xf32>
    %40 = arith.addf %38, %39 : vector<128x128xf32>
    %cst_23 = arith.constant 0.000000e+00 : f32
    %41 = vector.broadcast %cst_23 : f32 to vector<128x128xf32>
    %42 = arith.maximumf %40, %41 : vector<128x128xf32>
    %cst_24 = arith.constant dense<0.000000e+00> : vector<128xf32>
    %43 = vector.multi_reduction <add>, %42, %cst_24 [0] : vector<128x128xf32> to vector<128xf32>
    %44 = vector.shape_cast %43 : vector<128xf32> to vector<1x128xf32>
    %cst_25 = arith.constant 1.280000e+02 : f32
    %45 = vector.broadcast %cst_25 : f32 to vector<1x128xf32>
    %46 = arith.divf %44, %45 : vector<1x128xf32>
    %47 = arith.mulf %42, %42 : vector<128x128xf32>
    %cst_26 = arith.constant dense<0.000000e+00> : vector<128xf32>
    %48 = vector.multi_reduction <add>, %47, %cst_26 [0] : vector<128x128xf32> to vector<128xf32>
    %49 = vector.shape_cast %48 : vector<128xf32> to vector<1x128xf32>
    %cst_27 = arith.constant 1.280000e+02 : f32
    %50 = vector.broadcast %cst_27 : f32 to vector<1x128xf32>
    %51 = arith.divf %49, %50 : vector<1x128xf32>
    %52 = arith.mulf %46, %46 : vector<1x128xf32>
    %53 = arith.subf %51, %52 : vector<1x128xf32>
    %cst_28 = arith.constant 0.000000e+00 : f32
    %54 = vector.broadcast %cst_28 : f32 to vector<1x128xf32>
    %55 = arith.maximumf %53, %54 : vector<1x128xf32>
    %cst_29 = arith.constant 9.99999974E-6 : f32
    %56 = vector.broadcast %cst_29 : f32 to vector<1x128xf32>
    %57 = arith.addf %55, %56 : vector<1x128xf32>
    %58 = math.rsqrt %57 : vector<1x128xf32>
    %59 = arith.mulf %5, %58 : vector<1x128xf32>
    %60 = arith.mulf %46, %59 : vector<1x128xf32>
    %61 = arith.subf %6, %60 : vector<1x128xf32>
    %62 = vector.broadcast %59 : vector<1x128xf32> to vector<128x128xf32>
    %63 = arith.mulf %42, %62 : vector<128x128xf32>
    %64 = vector.broadcast %61 : vector<1x128xf32> to vector<128x128xf32>
    %65 = arith.addf %63, %64 : vector<128x128xf32>
    %66 = arith.truncf %65 : vector<128x128xf32> to vector<128x128xbf16>
    %c0_30 = arith.constant 0 : index
    %c0_31 = arith.constant 0 : index
    %67 = vector.load %arg5[%c0_30, %c0_31] : memref<128x128xbf16, #tpu.memory_space<vmem>>, vector<128x128xbf16>
    %cst_32 = arith.constant dense<0.000000e+00> : vector<128x128xf32>
    %68 = tpu.matmul %66, %67, %cst_32 {dimension_numbers = #tpu.dot_dimension_numbers<[1], [0], [0], [1], [0, 0, 1, 1], [], []>} : vector<128x128xbf16>, vector<128x128xbf16>, vector<128x128xf32> -> vector<128x128xf32>
    %c0_33 = arith.constant 0 : index
    %c0_34 = arith.constant 0 : index
    %69 = vector.load %arg6[%c0_33, %c0_34] : memref<1x128xf32, #tpu.memory_space<vmem>>, vector<1x128xf32>
    %70 = vector.broadcast %69 : vector<1x128xf32> to vector<128x128xf32>
    %71 = arith.addf %68, %70 : vector<128x128xf32>
    %cst_35 = arith.constant 0.000000e+00 : f32
    %72 = vector.broadcast %cst_35 : f32 to vector<128x128xf32>
    %73 = arith.maximumf %71, %72 : vector<128x128xf32>
    %74 = tpu.iota {dimensions = array<i32: 1>} : vector<128x128xi32>
    %c10_i32 = arith.constant 10 : i32
    %75 = vector.broadcast %c10_i32 : i32 to vector<128x128xi32>
    %76 = arith.cmpi slt, %74, %75 : vector<128x128xi32>
    %cst_36 = arith.constant -1.000000e+30 : f32
    %77 = vector.broadcast %cst_36 : f32 to vector<128x128xf32>
    %78 = arith.select %76, %73, %77 : vector<128x128xi1>, vector<128x128xf32>
    %cst_37 = arith.constant dense<0xFF800000> : vector<128xf32>
    %79 = vector.multi_reduction <maximumf>, %78, %cst_37 [1] : vector<128x128xf32> to vector<128xf32>
    %80 = vector.shape_cast %79 : vector<128xf32> to vector<128x1xf32>
    %81 = vector.broadcast %80 : vector<128x1xf32> to vector<128x128xf32>
    %82 = arith.subf %78, %81 : vector<128x128xf32>
    %83 = math.exp %82 : vector<128x128xf32>
    %cst_38 = arith.constant dense<0.000000e+00> : vector<128xf32>
    %84 = vector.multi_reduction <add>, %83, %cst_38 [1] : vector<128x128xf32> to vector<128xf32>
    %85 = vector.shape_cast %84 : vector<128xf32> to vector<128x1xf32>
    %86 = math.log %85 : vector<128x1xf32>
    %87 = arith.addf %86, %80 : vector<128x1xf32>
    %88 = vector.broadcast %87 : vector<128x1xf32> to vector<128x128xf32>
    %89 = arith.subf %78, %88 : vector<128x128xf32>
    %c0_39 = arith.constant 0 : index
    %c0_40 = arith.constant 0 : index
    %90 = vector.load %arg7[%c0_39, %c0_40] : memref<128x128xf32, #tpu.memory_space<vmem>>, vector<128x128xf32>
    tpu.vector_store %arg7[%c0_39, %c0_40], %89 {strides = array<i32>} : memref<128x128xf32, #tpu.memory_space<vmem>>, vector<128x128xf32>,
    return
  }
}

</mosaic_0001>

<bundles_post_ra>
// kernel: tpu_custom_call.1
= control target key start
LH: loop header
LB: loop body
LE: loop exit
PB: predicated region body
PF: predicated region fallthrough
CT: control target
= control target key end

     0   :  { %12 = vsyncpa [#allocation3], 0  ;;  %s2228_s0 = inlined_call_operand.hbm [shape: bf16[128,256], index: 0, kind: input, shape index: {}]   ;;  %s2229_s1 = inlined_call_operand.hbm [shape: bf16[256,128], index: 1, kind: input, shape index: {}]   ;;  %s2230_s2 = inlined_call_operand.hbm [shape: f32[3,128], index: 2, kind: input, shape index: {}]   ;;  %s2231_s3 = inlined_call_operand.hbm [shape: bf16[128,128], index: 3, kind: input, shape index: {}]   ;;  %s2232_s4 = inlined_call_operand.hbm [shape: f32[3,128], index: 4, kind: input, shape index: {}]   ;;  %s2233_s5 = inlined_call_operand.hbm [shape: bf16[128,128], index: 5, kind: input, shape index: {}]   ;;  %s2234_s6 = inlined_call_operand.vmem [shape: f32[1,128], index: 6, kind: input, shape index: {}]   ;;  %s2235_s7 = inlined_call_operand.hbm [shape: f32[128,128], index: 7, kind: output, shape index: {}]  }
   0x1   :  { %13 = vsyncpa [#allocation6], 0 }
   0x2   :  { %14 = vsyncpa [#allocation9], 0 }
   0x3   :  { %15 = vsyncpa [#allocation12], 0  ;;  %s34_s26 = sshll.u32 %s2229_s1, 4  ;;  %s35_s26 = int_to_ptr.hbm [resolvable:$true] %s34_s26 }
   0x4   :  { %16 = vsyncpa [#allocation4], 0  ;;  %s1706_s27 = smov [#allocation5]   ;;  %s58_s8 = sshll.u32 %s2231_s3, 4  ;;  %s59_s8 = int_to_ptr.hbm [resolvable:$true] %s58_s8 }
   0x5   :  { %s36_s28 = sshll.u32 %s1706_s27, 4  ;;  %s1707_s9 = smov 64   ;;  %s37_s28 = int_to_ptr.vmem [resolvable:$true] %s36_s28 }
   0x6   :  { %s1708_s10 = smov 4   ;;  %s1709_s11 = smov [#allocation8]  }
   0x7   :  { %42 = dma.hbm_to_vmem [thread:$0]  %s35_s26, 2048, %s37_s28, [#allocation6], %s1707_s9, %s1707_s9, %s1708_s10  }
   0x8   :  { %s60_s12 = sshll.u32 %s1709_s11, 4  ;;  %s21_s14 = sshll.u32 %s2228_s0, 4  ;;  %s61_s12 = int_to_ptr.vmem [resolvable:$true] %s60_s12  ;;  %s22_s14 = int_to_ptr.hbm [resolvable:$true] %s21_s14 }
   0x9   :  { %66 = dma.hbm_to_vmem [thread:$0]  %s59_s8, 1024, %s61_s12, [#allocation9], %s1707_s9, %s1707_s9, %s1708_s10  }
   0xa   :  { %s1710_s3 = smov [#allocation2]   ;;  %s48_s18 = sshll.u32 %s2230_s2, 4  ;;  %s49_s18 = int_to_ptr.hbm [resolvable:$true] %s48_s18 }
   0xb   :  { %s23_s15 = sshll.u32 %s1710_s3, 4  ;;  %s1711_s19 = smov 128   ;;  %s24_s15 = int_to_ptr.vmem [resolvable:$true] %s23_s15 }
   0xc   :  { %s1712_s20 = smov 8   ;;  %s1713_s0 = smov [#allocation7]  }
   0xd   :  { %29 = dma.hbm_to_vmem [thread:$0]  %s22_s14, 2048, %s24_s15, [#allocation3], %s1711_s19, %s1711_s19, %s1712_s20  }
   0xe   :  { %s50_s21 = sshll.u32 %s1713_s0, 4  ;;  %s72_s24 = sshll.u32 %s2232_s4, 4  ;;  %s51_s21 = int_to_ptr.vmem [resolvable:$true] %s50_s21  ;;  %s73_s24 = int_to_ptr.hbm [resolvable:$true] %s72_s24 }
   0xf   :  { %53 = dma.hbm_to_vmem [thread:$0]  %s49_s18, 64, %s51_s21, [#allocation6]  }
  0x10   :  { %s82_s2 = sshll.u32 %s2233_s5, 4  ;;  %s1714_s27 = smov [#allocation10]   ;;  %s83_s2 = int_to_ptr.hbm [resolvable:$true] %s82_s2 }
  0x11   :  { %s74_s28 = sshll.u32 %s1714_s27, 4  ;;  %s1715_s29 = smov [#allocation11]   ;;  %s75_s28 = int_to_ptr.vmem [resolvable:$true] %s74_s28 }
  0x12   :  { %77 = dma.hbm_to_vmem [thread:$0]  %s73_s24, 64, %s75_s28, [#allocation9]  }
  0x13   :  { %s84_s30 = sshll.u32 %s1715_s29, 4  ;;  %s85_s30 = int_to_ptr.vmem [resolvable:$true] %s84_s30 }
  0x14   :  { %90 = dma.hbm_to_vmem [thread:$0]  %s83_s2, 1024, %s85_s30, [#allocation12], %s1707_s9, %s1707_s9, %s1708_s10  }
  0x15   :  { %1696 = dma.done.wait [#allocation3], 2048  }
  0x16   :  { %1697 = vsyncadd [#allocation3], 4294965248 }
  0x17   :  { %1698 = dma.done.wait [#allocation6], 2112  }
  0x18   :  { %1699 = vsyncadd [#allocation6], 4294965184 }
  0x19   :  { %1700 = dma.done.wait [#allocation9], 1088  }
  0x1a   :  { %1701 = vsyncadd [#allocation9], 4294966208 }
  0x1b   :  { %1702 = dma.done.wait [#allocation12], 1024  }
  0x1c   :  { %1703 = vsyncadd [#allocation12], 4294966272  ;;  %v1418_v0 = vld [vmem:[#allocation5 + $0x38] sm:$0xff]  ;;  %v1417_v2 = vld [vmem:[#allocation5 + $0x30] sm:$0xff]  ;;  %s1187_s11 = sshll.u32 %s2235_s7, 4  ;;  %s1188_s11 = int_to_ptr.hbm [resolvable:$true] %s1187_s11 }
  0x1d   :  { %v1426_v1 = vld [vmem:[#allocation5 + $0x78] sm:$0xff]  ;;  %348 = vmatpush.bf16.msra.mxu0 %v1418_v0  ;;  %v1425_v3 = vld [vmem:[#allocation5 + $0x70] sm:$0xff]  ;;  %v1416_v4 = vld [vmem:[#allocation5 + $0x28] sm:$0xff] }
  0x1e   :  { %397 = vmatpush.bf16.msra.mxu1 %v1426_v1  ;;  %v1424_v5 = vld [vmem:[#allocation5 + $0x68] sm:$0xff]  ;;  %v1415_v6 = vld [vmem:[#allocation5 + $0x20] sm:$0xff]  ;;  %v1414_v8 = vld [vmem:[#allocation5 + $0x18] sm:$0xff] }
  0x1f   :  { %v1423_v7 = vld [vmem:[#allocation5 + $0x60] sm:$0xff]  ;;  %v1422_v9 = vld [vmem:[#allocation5 + $0x58] sm:$0xff]  ;;  %v1413_v10 = vld [vmem:[#allocation5 + $0x10] sm:$0xff] }
  0x20   :  { %v1421_v11 = vld [vmem:[#allocation5 + $0x50] sm:$0xff]  ;;  %v1412_v12 = vld [vmem:[#allocation5 + $0x8] sm:$0xff]  ;;  %v1411_v14 = vld [vmem:[#allocation5] sm:$0xff] }
  0x21   :  { %349 = vmatpush.bf16.msra.mxu0 %v1417_v2  ;;  %v1420_v13 = vld [vmem:[#allocation5 + $0x48] sm:$0xff]  ;;  %v1419_v15 = vld [vmem:[#allocation5 + $0x40] sm:$0xff]  ;;  %v1213_v22 = vld [vmem:[#allocation2 + $0x10] sm:$0xf] }
  0x22   :  { %398 = vmatpush.bf16.msra.mxu1 %v1425_v3  ;;  %v1205_v16 = vld [vmem:[#allocation2] sm:$0xf]  ;;  %v1396_v17 = vld [vmem:[#allocation2 + $0x4] sm:$0xf0]  ;;  %v1395_v18 = vld [vmem:[#allocation2 + $0x4] sm:$0xf] }
  0x23   :  { %v1207_v19 = vld [vmem:[#allocation2 + $0x8] sm:$0xf0]  ;;  %v1206_v20 = vor.u32 %v1396_v17, %v1205_v16  ;;  %v1398_v23 = vld [vmem:[#allocation2 + $0x14] sm:$0xf0]  ;;  %v1397_v24 = vld [vmem:[#allocation2 + $0x14] sm:$0xf] }
  0x24   :  { %v1210_v21 = vor.u32 %v1395_v18, %v1207_v19  ;;  %v1215_v25 = vld [vmem:[#allocation2 + $0x18] sm:$0xf0]  ;;  %v1214_v26 = vor.u32 %v1398_v23, %v1213_v22  ;;  %v1221_v28 = vld [vmem:[#allocation2 + $0x20] sm:$0xf]  ;;  %v1400_v29 = vld [vmem:[#allocation2 + $0x24] sm:$0xf0] }
  0x25   :  { %350 = vmatpush.bf16.msra.mxu0 %v1416_v4  ;;  %v1218_v27 = vor.u32 %v1397_v24, %v1215_v25  ;;  %v1399_v30 = vld [vmem:[#allocation2 + $0x24] sm:$0xf]  ;;  %v1223_v31 = vld [vmem:[#allocation2 + $0x28] sm:$0xf0]  ;;  %v1222_v32 = vor.u32 %v1400_v29, %v1221_v28  ;;  %v1229_v34 = vld [vmem:[#allocation2 + $0x30] sm:$0xf] }
  0x26   :  { %399 = vmatpush.bf16.msra.mxu1 %v1424_v5  ;;  %v1226_v33 = vor.u32 %v1399_v30, %v1223_v31  ;;  %v1402_v35 = vld [vmem:[#allocation2 + $0x34] sm:$0xf0]  ;;  %v1401_v36 = vld [vmem:[#allocation2 + $0x34] sm:$0xf]  ;;  %v1231_v37 = vld [vmem:[#allocation2 + $0x38] sm:$0xf0] }
  0x27   :  { %v1230_v38 = vor.u32 %v1402_v35, %v1229_v34  ;;  %v1234_v39 = vor.u32 %v1401_v36, %v1231_v37  ;;  %v1237_v40 = vld [vmem:[#allocation2 + $0x40] sm:$0xf]  ;;  %v1404_v41 = vld [vmem:[#allocation2 + $0x44] sm:$0xf0]  ;;  %v1403_v42 = vld [vmem:[#allocation2 + $0x44] sm:$0xf] }
  0x28   :  { %v1239_v43 = vld [vmem:[#allocation2 + $0x48] sm:$0xf0]  ;;  %v1238_v44 = vor.u32 %v1404_v41, %v1237_v40  ;;  %v1245_v46 = vld [vmem:[#allocation2 + $0x50] sm:$0xf]  ;;  %v1406_v47 = vld [vmem:[#allocation2 + $0x54] sm:$0xf0] }
  0x29   :  { %351 = vmatpush.bf16.msra.mxu0 %v1415_v6  ;;  %v1242_v45 = vor.u32 %v1403_v42, %v1239_v43  ;;  %v1405_v48 = vld [vmem:[#allocation2 + $0x54] sm:$0xf]  ;;  %v1247_v49 = vld [vmem:[#allocation2 + $0x58] sm:$0xf0]  ;;  %v1246_v50 = vor.u32 %v1406_v47, %v1245_v46  ;;  %v1253_v52 = vld [vmem:[#allocation2 + $0x60] sm:$0xf] }
  0x2a   :  { %400 = vmatpush.bf16.msra.mxu1 %v1423_v7  ;;  %v1250_v51 = vor.u32 %v1405_v48, %v1247_v49  ;;  %v1408_v53 = vld [vmem:[#allocation2 + $0x64] sm:$0xf0]  ;;  %v1407_v54 = vld [vmem:[#allocation2 + $0x64] sm:$0xf]  ;;  %v1255_v55 = vld [vmem:[#allocation2 + $0x68] sm:$0xf0] }
  0x2b   :  { %v1254_v56 = vor.u32 %v1408_v53, %v1253_v52  ;;  %v1258_v57 = vor.u32 %v1407_v54, %v1255_v55  ;;  %v1261_v58 = vld [vmem:[#allocation2 + $0x70] sm:$0xf]  ;;  %v1410_v59 = vld [vmem:[#allocation2 + $0x74] sm:$0xf0]  ;;  %v1409_v60 = vld [vmem:[#allocation2 + $0x74] sm:$0xf] }
  0x2c   :  { %v1263_v61 = vld [vmem:[#allocation2 + $0x78] sm:$0xf0]  ;;  %v1262_v62 = vor.u32 %v1410_v59, %v1261_v58  ;;  %v1788_v0 = vld [vmem:[#allocation7] ss:$0 sm:$0xff] }
  0x2d   :  { %352 = vmatpush.bf16.msra.mxu0 %v1414_v8  ;;  %v1266_v63 = vor.u32 %v1409_v60, %v1263_v61 }
  0x2e   :  { %401 = vmatpush.bf16.msra.mxu1 %v1422_v9 }
  0x31   :  { %353 = vmatpush.bf16.msra.mxu0 %v1413_v10 }
  0x32   :  { %402 = vmatpush.bf16.msra.mxu1 %v1421_v11 }
  0x35   :  { %354 = vmatpush.bf16.msra.mxu0 %v1412_v12 }
  0x36   :  { %403 = vmatpush.bf16.msra.mxu1 %v1420_v13 }
  0x39   :  { %355 = vmatpush.bf16.msra.mxu0 %v1411_v14 }
  0x3a   :  { %404 = vmatpush.bf16.msra.mxu1 %v1419_v15 }
  0x3c   :  { %356 = vmatmul.bf16.vlgmr.msra.gmra.mxu0 %v1206_v20 }
  0x3d   :  { %405 = vmatmul.bf16.vlgmr.msra.gmra.mxu1 %v1210_v21 }
  0x4c   :  { %361 = vmatmul.bf16.gmra.mxu0 %v1214_v26 }
  0x4d   :  { %410 = vmatmul.bf16.gmra.mxu1 %v1218_v27 }
  0x5c   :  { %366 = vmatmul.bf16.gmra.mxu0 %v1222_v32 }
  0x5d   :  { %415 = vmatmul.bf16.gmra.mxu1 %v1226_v33 }
  0x6c   :  { %371 = vmatmul.bf16.gmra.mxu0 %v1230_v38 }
  0x6d   :  { %420 = vmatmul.bf16.gmra.mxu1 %v1234_v39 }
  0x7c   :  { %376 = vmatmul.bf16.gmra.mxu0 %v1238_v44 }
  0x7d   :  { %425 = vmatmul.bf16.gmra.mxu1 %v1242_v45 }
  0x8c   :  { %381 = vmatmul.bf16.gmra.mxu0 %v1246_v50 }
  0x8d   :  { %430 = vmatmul.bf16.gmra.mxu1 %v1250_v51 }
  0x9c   :  { %386 = vmatmul.bf16.gmra.mxu0 %v1254_v56 }
  0x9d   :  { %435 = vmatmul.bf16.gmra.mxu1 %v1258_v57 }
  0xac   :  { %391 = vmatmul.bf16.gmra.mxu0 %v1262_v62 }
  0xad   :  { %440 = vmatmul.bf16.gmra.mxu1 %v1266_v63 }
  0xb9   :  { %v357_v1 = vpop.f32.mrf.mxu0 }
  0xba   :  { %v406_v2 = vpop.f32.mrf.mxu1  ;;  %v358_v3 = vadd.f32 %v1788_v0, %v357_v1 }
  0xbc   :  { %v407_v4 = vadd.f32 %v406_v2, %v358_v3 }
  0xbe   :  { %v1798_v37 = vmax.f32 %v407_v4, 0.0 }
  0xc0   :  { %v491_v46 = vmul.f32 %v1798_v37, %v1798_v37 }
  0xc1   :  { %v359_v5 = vpop.f32.mrf.mxu0 }
  0xc2   :  { %v408_v6 = vpop.f32.mrf.mxu1  ;;  %v360_v7 = vadd.f32 %v1788_v0, %v359_v5 }
  0xc4   :  { %v409_v8 = vadd.f32 %v408_v6, %v360_v7 }
  0xc6   :  { %v1795_v35 = vmax.f32 %v409_v8, 0.0 }
  0xc8   :  { %v492_v40 = vmul.f32 %v1795_v35, %v1795_v35  ;;  %v462_v48 = vadd.f32 %v1795_v35, %v1798_v37 }
  0xc9   :  { %v362_v9 = vpop.f32.mrf.mxu0 }
  0xca   :  { %v411_v10 = vpop.f32.mrf.mxu1  ;;  %v363_v11 = vadd.f32 %v1788_v0, %v362_v9  ;;  %v507_v52 = vadd.f32 %v492_v40, %v491_v46 }
  0xcc   :  { %v412_v12 = vadd.f32 %v411_v10, %v363_v11 }
  0xce   :  { %v1800_v38 = vmax.f32 %v412_v12, 0.0 }
  0xd0   :  { %v493_v47 = vmul.f32 %v1800_v38, %v1800_v38  ;;  %v463_v54 = vadd.f32 %v462_v48, %v1800_v38 }
  0xd1   :  { %v364_v13 = vpop.f32.mrf.mxu0 }
  0xd2   :  { %v413_v14 = vpop.f32.mrf.mxu1  ;;  %v365_v15 = vadd.f32 %v1788_v0, %v364_v13  ;;  %v508_v58 = vadd.f32 %v507_v52, %v493_v47 }
  0xd4   :  { %v414_v16 = vadd.f32 %v413_v14, %v365_v15 }
  0xd6   :  { %v1805_v41 = vmax.f32 %v414_v16, 0.0 }
  0xd8   :  { %v494_v53 = vmul.f32 %v1805_v41, %v1805_v41  ;;  %v464_v59 = vadd.f32 %v463_v54, %v1805_v41 }
  0xd9   :  { %v367_v17 = vpop.f32.mrf.mxu0 }
  0xda   :  { %v416_v18 = vpop.f32.mrf.mxu1  ;;  %v368_v19 = vadd.f32 %v1788_v0, %v367_v17  ;;  %v509_v63 = vadd.f32 %v508_v58, %v494_v53 }
  0xdc   :  { %v417_v20 = vadd.f32 %v416_v18, %v368_v19 }
  0xde   :  { %v1814_v49 = vmax.f32 %v417_v20, 0.0 }
  0xe0   :  { %v495_v60 = vmul.f32 %v1814_v49, %v1814_v49  ;;  %v465_v2 = vadd.f32 %v464_v59, %v1814_v49 }
  0xe1   :  { %v369_v21 = vpop.f32.mrf.mxu0 }
  0xe2   :  { %v418_v22 = vpop.f32.mrf.mxu1  ;;  %v370_v36 = vadd.f32 %v1788_v0, %v369_v21  ;;  %v510_v9 = vadd.f32 %v509_v63, %v495_v60 }
  0xe4   :  { %v419_v42 = vadd.f32 %v418_v22, %v370_v36 }
  0xe6   :  { %v1820_v55 = vmax.f32 %v419_v42, 0.0 }
  0xe8   :  { %v496_v3 = vmul.f32 %v1820_v55, %v1820_v55  ;;  %v466_v10 = vadd.f32 %v465_v2, %v1820_v55 }
  0xe9   :  { %v372_v23 = vpop.f32.mrf.mxu0 }
  0xea   :  { %v421_v24 = vpop.f32.mrf.mxu1  ;;  %v373_v39 = vadd.f32 %v1788_v0, %v372_v23  ;;  %v511_v15 = vadd.f32 %v510_v9, %v496_v3 }
  0xec   :  { %v422_v50 = vadd.f32 %v421_v24, %v373_v39 }
  0xee   :  { %v1826_v61 = vmax.f32 %v422_v50, 0.0 }
  0xf0   :  { %v497_v11 = vmul.f32 %v1826_v61, %v1826_v61  ;;  %v467_v16 = vadd.f32 %v466_v10, %v1826_v61 }
  0xf1   :  { %v374_v25 = vpop.f32.mrf.mxu0 }
  0xf2   :  { %v423_v26 = vpop.f32.mrf.mxu1  ;;  %v375_v43 = vadd.f32 %v1788_v0, %v374_v25  ;;  %v512_v21 = vadd.f32 %v511_v15, %v497_v11  ;;  %v1431_v15 = vld [vmem:[#allocation8 + $0x20] sm:$0xff] }
  0xf4   :  { %v424_v56 = vadd.f32 %v423_v26, %v375_v43 }
  0xf6   :  { %v1832_v4 = vmax.f32 %v424_v56, 0.0 }
  0xf8   :  { %v498_v17 = vmul.f32 %v1832_v4, %v1832_v4  ;;  %v468_v22 = vadd.f32 %v467_v16, %v1832_v4 }
  0xf9   :  { %v377_v27 = vpop.f32.mrf.mxu0 }
  0xfa   :  { %v426_v28 = vpop.f32.mrf.mxu1  ;;  %v378_v51 = vadd.f32 %v1788_v0, %v377_v27  ;;  %v513_v26 = vadd.f32 %v512_v21, %v498_v17 }
  0xfc   :  { %v427_v62 = vadd.f32 %v426_v28, %v378_v51 }
  0xfe   :  { %v1838_v12 = vmax.f32 %v427_v62, 0.0 }
 0x100   :  { %v499_v23 = vmul.f32 %v1838_v12, %v1838_v12  ;;  %v469_v27 = vadd.f32 %v468_v22, %v1838_v12  ;;  %v1430_v22 = vld [vmem:[#allocation8 + $0x18] sm:$0xff] }
 0x101   :  { %v379_v29 = vpop.f32.mrf.mxu0 }
 0x102   :  { %v428_v30 = vpop.f32.mrf.mxu1  ;;  %v380_v57 = vadd.f32 %v1788_v0, %v379_v29  ;;  %v514_v36 = vadd.f32 %v513_v26, %v499_v23 }
 0x104   :  { %v429_v5 = vadd.f32 %v428_v30, %v380_v57  ;;  %v1433_v57 = vld [vmem:[#allocation8 + $0x30] sm:$0xff] }
 0x106   :  { %v1844_v18 = vmax.f32 %v429_v5, 0.0 }
 0x108   :  { %v500_v28 = vmul.f32 %v1844_v18, %v1844_v18  ;;  %v470_v39 = vadd.f32 %v469_v27, %v1844_v18 }
 0x109   :  { %v382_v31 = vpop.f32.mrf.mxu0 }
 0x10a   :  { %v431_v32 = vpop.f32.mrf.mxu1  ;;  %v383_v1 = vadd.f32 %v1788_v0, %v382_v31 }
 0x10c   :  { %v432_v13 = vadd.f32 %v431_v32, %v383_v1 }
 0x10e   :  { %v1850_v24 = vmax.f32 %v432_v13, 0.0 }
 0x110   :  { %v501_v40 = vmul.f32 %v1850_v24, %v1850_v24  ;;  %v471_v46 = vadd.f32 %v470_v39, %v1850_v24  ;;  %v1428_v39 = vld [vmem:[#allocation8 + $0x8] sm:$0xff] }
 0x111   :  { %v384_v33 = vpop.f32.mrf.mxu0 }
 0x112   :  { %v433_v34 = vpop.f32.mrf.mxu1  ;;  %v385_v8 = vadd.f32 %v1788_v0, %v384_v33 }
 0x114   :  { %v434_v19 = vadd.f32 %v433_v34, %v385_v8  ;;  %v1716_v34 = vmov 128.0  }
 0x115   :  { %1458 = vrcp.f32 %v1716_v34 }
 0x116   :  { %v1855_v31 = vmax.f32 %v434_v19, 0.0 }
 0x118   :  { %v502_v47 = vmul.f32 %v1855_v31, %v1855_v31  ;;  %v472_v52 = vadd.f32 %v471_v46, %v1855_v31  ;;  %v1427_v46 = vld [vmem:[#allocation8] sm:$0xff] }
 0x119   :  { %v387_v44 = vpop.f32.mrf.mxu0 }
 0x11a   :  { %v436_v45 = vpop.f32.mrf.mxu1  ;;  %v388_v14 = vadd.f32 %v1788_v0, %v387_v44  ;;  %v1434_v44 = vld [vmem:[#allocation8 + $0x38] sm:$0xff] }
 0x11b   :  { %653 = vmatpush.bf16.msra.mxu2 %v1434_v44  ;;  %v1459_v50 = vpop.eup %1458 }
 0x11c   :  { %v437_v25 = vadd.f32 %v436_v45, %v388_v14  ;;  %v515_v45 = vadd.f32 %v514_v36, %v500_v28  ;;  %v484_v1 = vmul.f32 128.0, %v1459_v50  ;;  %vm488_vm0 = vweird.f32 %v1459_v50 }
 0x11e   :  { %v1861_v42 = vmax.f32 %v437_v25, 0.0  ;;  %v516_v51 = vadd.f32 %v515_v45, %v501_v40  ;;  %v485_v11 = vsub.f32 1.0, %v484_v1  ;;  %v135_v1 = vld [vmem:[#allocation7 + $0x2] sm:$0x1] }
 0x11f   :  { %654 = vmatpush.bf16.msra.mxu2 %v1433_v57 }
 0x120   :  { %v503_v53 = vmul.f32 %v1861_v42, %v1861_v42  ;;  %v517_v58 = vadd.f32 %v516_v51, %v502_v47  ;;  %v473_v59 = vadd.f32 %v472_v52, %v1861_v42  ;;  %v486_v19 = vmul.f32 %v1459_v50, %v485_v11 }
 0x121   :  { %v389_v6 = vpop.f32.mrf.mxu0 }
 0x122   :  { %v438_v7 = vpop.f32.mrf.mxu1  ;;  %v390_v20 = vadd.f32 %v1788_v0, %v389_v6  ;;  %v518_v2 = vadd.f32 %v517_v58, %v503_v53  ;;  %v487_v26 = vadd.f32 %v1459_v50, %v486_v19 }
 0x124   :  { %v439_v32 = vadd.f32 %v438_v7, %v390_v20  ;;  %v1432_v7 = vld [vmem:[#allocation8 + $0x28] sm:$0xff] }
 0x125   :  { %655 = vmatpush.bf16.msra.mxu2 %v1432_v7 }
 0x126   :  { %v1866_v48 = vmax.f32 %v439_v32, 0.0 }
 0x128   :  { %v504_v60 = vmul.f32 %v1866_v48, %v1866_v48  ;;  %v474_v3 = vadd.f32 %v473_v59, %v1866_v48  ;;  %v134_v59 = vld [vmem:[#allocation7 + $0x1] sm:$0x1] }
 0x129   :  { %v392_v29 = vpop.f32.mrf.mxu0  ;;  %656 = vmatpush.bf16.msra.mxu2 %v1431_v15 }
 0x12a   :  { %v441_v30 = vpop.f32.mrf.mxu1  ;;  %v393_v33 = vadd.f32 %v1788_v0, %v392_v29  ;;  %v519_v8 = vadd.f32 %v518_v2, %v504_v60  ;;  %v1429_v29 = vld [vmem:[#allocation8 + $0x10] sm:$0xff] }
 0x12c   :  { %v442_v43 = vadd.f32 %v441_v30, %v393_v33  ;;  %v1886_v33 = vsel %vm488_vm0, %v1459_v50, %v487_v26 }
 0x12d   :  { %657 = vmatpush.bf16.msra.mxu2 %v1430_v22 }
 0x12e   :  { %v1871_v54 = vmax.f32 %v442_v43, 0.0 }
 0x130   :  { %v505_v5 = vmul.f32 %v1871_v54, %v1871_v54  ;;  %v475_v9 = vadd.f32 %v474_v3, %v1871_v54 }
 0x131   :  { %v394_v56 = vpop.f32.mrf.mxu0  ;;  %658 = vmatpush.bf16.msra.mxu2 %v1429_v29 }
 0x132   :  { %v395_v62 = vadd.f32 %v1788_v0, %v394_v56  ;;  %v443_v63 = vpop.f32.mrf.mxu1  ;;  %v520_v13 = vadd.f32 %v519_v8, %v505_v5 }
 0x134   :  { %v444_v6 = vadd.f32 %v443_v63, %v395_v62 }
 0x135   :  { %659 = vmatpush.bf16.msra.mxu2 %v1428_v39 }
 0x136   :  { %v1881_v10 = vmax.f32 %v444_v6, 0.0 }
 0x138   :  { %v476_v0 = vadd.f32 %v475_v9, %v1881_v10  ;;  %v506_v14 = vmul.f32 %v1881_v10, %v1881_v10 }
 0x139   :  { %660 = vmatpush.bf16.msra.mxu2 %v1427_v46 }
 0x13a   :  { %v477_v16 = vrot.slane %v476_v0, 4  ;;  %v521_v17 = vadd.f32 %v520_v13, %v506_v14 }
 0x13c   :  { %v478_v20 = vadd.f32 %v477_v16, %v476_v0  ;;  %v522_v21 = vrot.slane %v521_v17, 4 }
 0x13e   :  { %v479_v23 = vrot.slane %v478_v20, 2  ;;  %v523_v25 = vadd.f32 %v522_v21, %v521_v17 }
 0x140   :  { %v480_v27 = vadd.f32 %v479_v23, %v478_v20  ;;  %v524_v28 = vrot.slane %v523_v25, 2 }
 0x142   :  { %v481_v30 = vrot.slane %v480_v27, 1  ;;  %v525_v32 = vadd.f32 %v524_v28, %v523_v25 }
 0x144   :  { %v482_v34 = vadd.f32 %v481_v30, %v480_v27  ;;  %v526_v36 = vrot.slane %v525_v32, 1 }
 0x146   :  { %v490_v40 = vmul.f32 %v1886_v33, %v482_v34  ;;  %v527_v43 = vadd.f32 %v526_v36, %v525_v32 }
 0x148   :  { %v528_v44 = vmul.f32 %v527_v43, %v1886_v33  ;;  %v529_v45 = vmul.f32 %v490_v40, %v490_v40 }
 0x14a   :  { %v530_v47 = vsub.f32 %v528_v44, %v529_v45 }
 0x14c   :  { %v531_v51 = vmax.f32 %v530_v47, 0.0 }
 0x14e   :  { %v532_v52 = vadd.f32 1e-05, %v531_v51 }
 0x150   :  { %1460 = vrsqrt.f32 %v532_v52  ;;  %vm539_vm2 = vweird.f32 %v532_v52 }
 0x156   :  { %v1461_v53 = vpop.eup %1460 }
 0x157   :  { %v534_v50 = vmul.f32 %v1461_v53, %v532_v52  ;;  %vm540_vm1 = vweird.f32 %v1461_v53 }
 0x158   :  { %vm541_vm3 = vmor %vm539_vm2, %vm540_vm1 }
 0x159   :  { %v535_v56 = vmul.f32 %v1461_v53, %v534_v50 }
 0x15b   :  { %v536_v57 = vmul.f32 0.5, %v535_v56 }
 0x15d   :  { %v537_v58 = vsub.f32 1.5, %v536_v57 }
 0x15f   :  { %v538_v60 = vmul.f32 %v1461_v53, %v537_v58 }
 0x161   :  { %v542_v62 = vsel %vm541_vm3, %v1461_v53, %v538_v60 }
 0x162   :  { %v543_v63 = vmul.f32 %v542_v62, %v134_v59 }
 0x164   :  { %v544_v2 = vmul.f32 %v543_v63, %v490_v40  ;;  %v546_v3 = vperm.slane %v543_v63, 0 }
 0x166   :  { %v545_v5 = vsub.f32 %v135_v1, %v544_v2  ;;  %v547_v7 = vmul.f32 %v546_v3, %v1798_v37  ;;  %v548_v8 = vmul.f32 %v546_v3, %v1795_v35  ;;  %v555_v13 = vmul.f32 %v546_v3, %v1838_v12 }
 0x167   :  { %v556_v0 = vmul.f32 %v546_v3, %v1844_v18  ;;  %v557_v14 = vmul.f32 %v546_v3, %v1850_v24  ;;  %v558_v15 = vmul.f32 %v546_v3, %v1855_v31  ;;  %v559_v16 = vmul.f32 %v546_v3, %v1861_v42 }
 0x168   :  { %v563_v6 = vperm.slane %v545_v5, 0  ;;  %v560_v21 = vmul.f32 %v546_v3, %v1866_v48  ;;  %v561_v12 = vmul.f32 %v546_v3, %v1871_v54  ;;  %v562_v24 = vmul.f32 %v546_v3, %v1881_v10 }
 0x169   :  { %v549_v28 = vmul.f32 %v546_v3, %v1800_v38  ;;  %v550_v29 = vmul.f32 %v546_v3, %v1805_v41  ;;  %v551_v34 = vmul.f32 %v546_v3, %v1814_v49  ;;  %v552_v36 = vmul.f32 %v546_v3, %v1820_v55 }
 0x16a   :  { %v564_v9 = vadd.f32 %v563_v6, %v547_v7  ;;  %v565_v11 = vadd.f32 %v563_v6, %v548_v8  ;;  %v572_v19 = vadd.f32 %v563_v6, %v555_v13  ;;  %v573_v20 = vadd.f32 %v563_v6, %v556_v0 }
 0x16b   :  { %v574_v37 = vadd.f32 %v563_v6, %v557_v14  ;;  %v575_v22 = vadd.f32 %v563_v6, %v558_v15  ;;  %v576_v23 = vadd.f32 %v563_v6, %v559_v16  ;;  %v577_v25 = vadd.f32 %v563_v6, %v560_v21 }
 0x16c   :  { %v580_v17 = vpack.c.bf16 %v565_v11, %v564_v9  ;;  %v584_v35 = vpack.c.bf16 %v573_v20, %v572_v19  ;;  %v578_v31 = vadd.f32 %v563_v6, %v561_v12  ;;  %v579_v27 = vadd.f32 %v563_v6, %v562_v24 }
 0x16d   :  { %v585_v18 = vpack.c.bf16 %v575_v22, %v574_v37  ;;  %v586_v26 = vpack.c.bf16 %v577_v25, %v576_v23  ;;  %v566_v48 = vadd.f32 %v563_v6, %v549_v28  ;;  %v567_v30 = vadd.f32 %v563_v6, %v550_v29 }
 0x16e   :  { %661 = vmatmul.bf16.vlgmr.msra.gmra.mxu2 %v580_v17  ;;  %v587_v42 = vpack.c.bf16 %v579_v27, %v578_v31  ;;  %v568_v54 = vadd.f32 %v563_v6, %v551_v34  ;;  %v569_v39 = vadd.f32 %v563_v6, %v552_v36  ;;  %v553_v10 = vmul.f32 %v546_v3, %v1826_v61 }
 0x16f   :  { %v581_v32 = vpack.c.bf16 %v567_v30, %v566_v48  ;;  %v554_v43 = vmul.f32 %v546_v3, %v1832_v4  ;;  %v1906_v4 = vld [vmem:[#allocation10] ss:$0 sm:$0xff] }
 0x170   :  { %v582_v40 = vpack.c.bf16 %v569_v39, %v568_v54  ;;  %v570_v44 = vadd.f32 %v563_v6, %v553_v10 }
 0x171   :  { %v571_v38 = vadd.f32 %v563_v6, %v554_v43 }
 0x173   :  { %v583_v45 = vpack.c.bf16 %v571_v38, %v570_v44 }
 0x17e   :  { %666 = vmatmul.bf16.gmra.mxu2 %v581_v32 }
 0x18e   :  { %671 = vmatmul.bf16.gmra.mxu2 %v582_v40 }
 0x19e   :  { %676 = vmatmul.bf16.gmra.mxu2 %v583_v45 }
 0x1ae   :  { %681 = vmatmul.bf16.gmra.mxu2 %v584_v35 }
 0x1be   :  { %686 = vmatmul.bf16.gmra.mxu2 %v585_v18 }
 0x1ce   :  { %691 = vmatmul.bf16.gmra.mxu2 %v586_v26 }
 0x1de   :  { %696 = vmatmul.bf16.gmra.mxu2 %v587_v42 }
 0x1f1   :  { %v662_v41 = vpop.f32.mrf.mxu2 }
 0x1f2   :  { %v663_v58 = vadd.f32 %v1906_v4, %v662_v41 }
 0x1f4   :  { %v1914_v1 = vmax.f32 %v663_v58, 0.0 }
 0x1f6   :  { %v740_v8 = vmul.f32 %v1914_v1, %v1914_v1 }
 0x1f9   :  { %v664_v49 = vpop.f32.mrf.mxu2 }
 0x1fa   :  { %v665_v57 = vadd.f32 %v1906_v4, %v664_v49 }
 0x1fc   :  { %v1911_v62 = vmax.f32 %v665_v57, 0.0 }
 0x1fe   :  { %v741_v5 = vmul.f32 %v1911_v62, %v1911_v62  ;;  %v718_v14 = vadd.f32 %v1911_v62, %v1914_v1 }
 0x200   :  { %v756_v15 = vadd.f32 %v741_v5, %v740_v8 }
 0x201   :  { %v667_v46 = vpop.f32.mrf.mxu2 }
 0x202   :  { %v668_v59 = vadd.f32 %v1906_v4, %v667_v46 }
 0x204   :  { %v1916_v2 = vmax.f32 %v668_v59, 0.0 }
 0x206   :  { %v742_v9 = vmul.f32 %v1916_v2, %v1916_v2  ;;  %v719_v20 = vadd.f32 %v718_v14, %v1916_v2 }
 0x208   :  { %v757_v21 = vadd.f32 %v756_v15, %v742_v9 }
 0x209   :  { %v669_v55 = vpop.f32.mrf.mxu2 }
 0x20a   :  { %v670_v63 = vadd.f32 %v1906_v4, %v669_v55 }
 0x20c   :  { %v1921_v6 = vmax.f32 %v670_v63, 0.0 }
 0x20e   :  { %v743_v16 = vmul.f32 %v1921_v6, %v1921_v6  ;;  %v720_v23 = vadd.f32 %v719_v20, %v1921_v6 }
 0x210   :  { %v758_v25 = vadd.f32 %v757_v21, %v743_v16  ;;  %v1442_v21 = vld [vmem:[#allocation11 + $0x38] sm:$0xff] }
 0x211   :  { %v672_v47 = vpop.f32.mrf.mxu2  ;;  %905 = vmatpush.bf16.msra.mxu3 %v1442_v21 }
 0x212   :  { %v673_v3 = vadd.f32 %v1906_v4, %v672_v47 }
 0x214   :  { %v1928_v11 = vmax.f32 %v673_v3, 0.0 }
 0x216   :  { %v744_v37 = vmul.f32 %v1928_v11, %v1928_v11  ;;  %v721_v24 = vadd.f32 %v720_v23, %v1928_v11 }
 0x218   :  { %v759_v31 = vadd.f32 %v758_v25, %v744_v37 }
 0x219   :  { %v674_v51 = vpop.f32.mrf.mxu2 }
 0x21a   :  { %v675_v7 = vadd.f32 %v1906_v4, %v674_v51 }
 0x21c   :  { %v1935_v17 = vmax.f32 %v675_v7, 0.0 }
 0x21e   :  { %v745_v12 = vmul.f32 %v1935_v17, %v1935_v17  ;;  %v722_v29 = vadd.f32 %v721_v24, %v1935_v17  ;;  %v1441_v24 = vld [vmem:[#allocation11 + $0x30] sm:$0xff] }
 0x21f   :  { %906 = vmatpush.bf16.msra.mxu3 %v1441_v24 }
 0x220   :  { %v760_v30 = vadd.f32 %v759_v31, %v745_v12 }
 0x221   :  { %v677_v52 = vpop.f32.mrf.mxu2 }
 0x222   :  { %v678_v13 = vadd.f32 %v1906_v4, %v677_v52 }
 0x224   :  { %v1941_v22 = vmax.f32 %v678_v13, 0.0 }
 0x226   :  { %v746_v27 = vmul.f32 %v1941_v22, %v1941_v22  ;;  %v723_v34 = vadd.f32 %v722_v29, %v1941_v22 }
 0x228   :  { %v761_v39 = vadd.f32 %v760_v30, %v746_v27 }
 0x229   :  { %v679_v53 = vpop.f32.mrf.mxu2 }
 0x22a   :  { %v680_v19 = vadd.f32 %v1906_v4, %v679_v53 }
 0x22c   :  { %v1947_v18 = vmax.f32 %v680_v19, 0.0 }
 0x22e   :  { %v747_v32 = vmul.f32 %v1947_v18, %v1947_v18  ;;  %v724_v10 = vadd.f32 %v723_v34, %v1947_v18  ;;  %v1439_v34 = vld [vmem:[#allocation11 + $0x20] sm:$0xff] }
 0x230   :  { %v762_v38 = vadd.f32 %v761_v39, %v747_v32 }
 0x231   :  { %v682_v50 = vpop.f32.mrf.mxu2 }
 0x232   :  { %v683_v35 = vadd.f32 %v1906_v4, %v682_v50 }
 0x234   :  { %v1953_v42 = vmax.f32 %v683_v35, 0.0 }
 0x236   :  { %v748_v40 = vmul.f32 %v1953_v42, %v1953_v42  ;;  %v725_v45 = vadd.f32 %v724_v10, %v1953_v42 }
 0x238   :  { %v763_v55 = vadd.f32 %v762_v38, %v748_v40 }
 0x239   :  { %v684_v61 = vpop.f32.mrf.mxu2 }
 0x23a   :  { %v685_v26 = vadd.f32 %v1906_v4, %v684_v61 }
 0x23c   :  { %v1960_v36 = vmax.f32 %v685_v26, 0.0 }
 0x23e   :  { %v749_v41 = vmul.f32 %v1960_v36, %v1960_v36  ;;  %v726_v51 = vadd.f32 %v725_v45, %v1960_v36 }
 0x240   :  { %v764_v61 = vadd.f32 %v763_v55, %v749_v41  ;;  %v1437_v41 = vld [vmem:[#allocation11 + $0x10] sm:$0xff] }
 0x241   :  { %v687_v56 = vpop.f32.mrf.mxu2 }
 0x242   :  { %v688_v48 = vadd.f32 %v1906_v4, %v687_v56 }
 0x244   :  { %v1966_v43 = vmax.f32 %v688_v48, 0.0 }
 0x246   :  { %v750_v52 = vmul.f32 %v1966_v43, %v1966_v43  ;;  %v727_v56 = vadd.f32 %v726_v51, %v1966_v43 }
 0x248   :  { %v765_v59 = vadd.f32 %v764_v61, %v750_v52  ;;  %v1435_v52 = vld [vmem:[#allocation11] sm:$0xff] }
 0x249   :  { %v689_v60 = vpop.f32.mrf.mxu2 }
 0x24a   :  { %v690_v54 = vadd.f32 %v1906_v4, %v689_v60 }
 0x24c   :  { %v1972_v49 = vmax.f32 %v690_v54, 0.0 }
 0x24e   :  { %v751_v57 = vmul.f32 %v1972_v49, %v1972_v49  ;;  %v728_v60 = vadd.f32 %v727_v56, %v1972_v49 }
 0x250   :  { %v766_v5 = vadd.f32 %v765_v59, %v751_v57 }
 0x251   :  { %v692_v0 = vpop.f32.mrf.mxu2 }
 0x252   :  { %v693_v44 = vadd.f32 %v1906_v4, %v692_v0 }
 0x254   :  { %v1978_v53 = vmax.f32 %v693_v44, 0.0  ;;  %v1438_v44 = vld [vmem:[#allocation11 + $0x18] sm:$0xff] }
 0x256   :  { %v752_v63 = vmul.f32 %v1978_v53, %v1978_v53  ;;  %v729_v7 = vadd.f32 %v728_v60, %v1978_v53  ;;  %v137_v60 = vld [vmem:[#allocation10 + $0x1] sm:$0x1] }
 0x258   :  { %v767_v13 = vadd.f32 %v766_v5, %v752_v63 }
 0x259   :  { %v694_v28 = vpop.f32.mrf.mxu2 }
 0x25a   :  { %v695_v46 = vadd.f32 %v1906_v4, %v694_v28  ;;  %v1440_v28 = vld [vmem:[#allocation11 + $0x28] sm:$0xff] }
 0x25b   :  { %907 = vmatpush.bf16.msra.mxu3 %v1440_v28 }
 0x25c   :  { %v1984_v58 = vmax.f32 %v695_v46, 0.0 }
 0x25e   :  { %v753_v8 = vmul.f32 %v1984_v58, %v1984_v58  ;;  %v730_v0 = vadd.f32 %v729_v7, %v1984_v58  ;;  %v138_v7 = vld [vmem:[#allocation10 + $0x2] sm:$0x1] }
 0x25f   :  { %908 = vmatpush.bf16.msra.mxu3 %v1439_v34 }
 0x260   :  { %v768_v16 = vadd.f32 %v767_v13, %v753_v8 }
 0x261   :  { %v697_v47 = vpop.f32.mrf.mxu2 }
 0x262   :  { %v698_v50 = vadd.f32 %v1906_v4, %v697_v47  ;;  %v1436_v47 = vld [vmem:[#allocation11 + $0x8] sm:$0xff] }
 0x263   :  { %909 = vmatpush.bf16.msra.mxu3 %v1438_v44 }
 0x264   :  { %v1989_v3 = vmax.f32 %v698_v50, 0.0 }
 0x266   :  { %v754_v14 = vmul.f32 %v1989_v3, %v1989_v3  ;;  %v731_v19 = vadd.f32 %v730_v0, %v1989_v3 }
 0x267   :  { %910 = vmatpush.bf16.msra.mxu3 %v1437_v41 }
 0x268   :  { %v769_v37 = vadd.f32 %v768_v16, %v754_v14 }
 0x269   :  { %v699_v9 = vpop.f32.mrf.mxu2 }
 0x26a   :  { %v700_v15 = vadd.f32 %v1906_v4, %v699_v9 }
 0x26b   :  { %911 = vmatpush.bf16.msra.mxu3 %v1436_v47 }
 0x26c   :  { %v1999_v20 = vmax.f32 %v700_v15, 0.0 }
 0x26e   :  { %v732_v35 = vadd.f32 %v731_v19, %v1999_v20  ;;  %v755_v23 = vmul.f32 %v1999_v20, %v1999_v20 }
 0x26f   :  { %912 = vmatpush.bf16.msra.mxu3 %v1435_v52 }
 0x270   :  { %v733_v25 = vrot.slane %v732_v35, 4  ;;  %v770_v12 = vadd.f32 %v769_v37, %v755_v23 }
 0x272   :  { %v734_v26 = vadd.f32 %v733_v25, %v732_v35  ;;  %v771_v31 = vrot.slane %v770_v12, 4 }
 0x274   :  { %v735_v4 = vrot.slane %v734_v26, 2  ;;  %v772_v27 = vadd.f32 %v771_v31, %v770_v12 }
 0x276   :  { %v736_v29 = vadd.f32 %v735_v4, %v734_v26  ;;  %v773_v48 = vrot.slane %v772_v27, 2 }
 0x278   :  { %v737_v30 = vrot.slane %v736_v29, 1  ;;  %v774_v32 = vadd.f32 %v773_v48, %v772_v27 }
 0x27a   :  { %v738_v54 = vadd.f32 %v737_v30, %v736_v29  ;;  %v775_v39 = vrot.slane %v774_v32, 1 }
 0x27c   :  { %v739_v40 = vmul.f32 %v738_v54, %v1886_v33  ;;  %v776_v10 = vadd.f32 %v775_v39, %v774_v32 }
 0x27e   :  { %v777_v38 = vmul.f32 %v776_v10, %v1886_v33  ;;  %v778_v45 = vmul.f32 %v739_v40, %v739_v40 }
 0x280   :  { %v779_v46 = vsub.f32 %v777_v38, %v778_v45 }
 0x282   :  { %v780_v55 = vmax.f32 %v779_v46, 0.0 }
 0x284   :  { %v781_v51 = vadd.f32 1e-05, %v780_v55 }
 0x286   :  { %1462 = vrsqrt.f32 %v781_v51  ;;  %vm788_vm5 = vweird.f32 %v781_v51 }
 0x28c   :  { %v1463_v50 = vpop.eup %1462 }
 0x28d   :  { %v783_v61 = vmul.f32 %v1463_v50, %v781_v51  ;;  %vm789_vm4 = vweird.f32 %v1463_v50 }
 0x28e   :  { %vm790_vm6 = vmor %vm788_vm5, %vm789_vm4 }
 0x28f   :  { %v784_v56 = vmul.f32 %v1463_v50, %v783_v61 }
 0x291   :  { %v785_v57 = vmul.f32 0.5, %v784_v56 }
 0x293   :  { %v786_v59 = vsub.f32 1.5, %v785_v57 }
 0x295   :  { %v787_v33 = vmul.f32 %v1463_v50, %v786_v59 }
 0x297   :  { %v791_v63 = vsel %vm790_vm6, %v1463_v50, %v787_v33 }
 0x298   :  { %v792_v5 = vmul.f32 %v791_v63, %v137_v60 }
 0x29a   :  { %v793_v8 = vmul.f32 %v792_v5, %v739_v40  ;;  %v795_v9 = vperm.slane %v792_v5, 0 }
 0x29c   :  { %v794_v13 = vsub.f32 %v138_v7, %v793_v8  ;;  %v796_v14 = vmul.f32 %v795_v9, %v1914_v1  ;;  %v797_v15 = vmul.f32 %v795_v9, %v1911_v62  ;;  %v804_v21 = vmul.f32 %v795_v9, %v1953_v42 }
 0x29d   :  { %v805_v37 = vmul.f32 %v795_v9, %v1960_v36  ;;  %v806_v35 = vmul.f32 %v795_v9, %v1966_v43  ;;  %v807_v23 = vmul.f32 %v795_v9, %v1972_v49  ;;  %v808_v25 = vmul.f32 %v795_v9, %v1978_v53 }
 0x29e   :  { %v812_v0 = vperm.slane %v794_v13, 0  ;;  %v809_v31 = vmul.f32 %v795_v9, %v1984_v58  ;;  %v810_v42 = vmul.f32 %v795_v9, %v1989_v3  ;;  %v811_v43 = vmul.f32 %v795_v9, %v1999_v20 }
 0x29f   :  { %v798_v30 = vmul.f32 %v795_v9, %v1916_v2  ;;  %v799_v32 = vmul.f32 %v795_v9, %v1921_v6  ;;  %v800_v39 = vmul.f32 %v795_v9, %v1928_v11  ;;  %v801_v40 = vmul.f32 %v795_v9, %v1935_v17  ;;  %v2025_v11 = vld [vmem:[%s2234_s6] ss:$0 sm:$0xff]  ;;  %s1717_s6 = smov [#allocation13]  }
 0x2a0   :  { %v813_v16 = vadd.f32 %v812_v0, %v796_v14  ;;  %v814_v19 = vadd.f32 %v812_v0, %v797_v15  ;;  %v821_v24 = vadd.f32 %v812_v0, %v804_v21  ;;  %v822_v26 = vadd.f32 %v812_v0, %v805_v37  ;;  %s1185_s8 = sshll.u32 %s1717_s6, 4  ;;  %s1186_s8 = int_to_ptr.vmem [resolvable:$true] %s1185_s8 }
 0x2a1   :  { %v823_v1 = vadd.f32 %v812_v0, %v806_v35  ;;  %v824_v4 = vadd.f32 %v812_v0, %v807_v23  ;;  %v825_v27 = vadd.f32 %v812_v0, %v808_v25  ;;  %v826_v28 = vadd.f32 %v812_v0, %v809_v31 }
 0x2a2   :  { %v829_v12 = vpack.c.bf16 %v814_v19, %v813_v16  ;;  %v833_v62 = vpack.c.bf16 %v822_v26, %v821_v24  ;;  %v827_v49 = vadd.f32 %v812_v0, %v810_v42  ;;  %v828_v48 = vadd.f32 %v812_v0, %v811_v43 }
 0x2a3   :  { %v834_v36 = vpack.c.bf16 %v824_v4, %v823_v1  ;;  %v835_v29 = vpack.c.bf16 %v826_v28, %v825_v27  ;;  %v815_v58 = vadd.f32 %v812_v0, %v798_v30  ;;  %v816_v34 = vadd.f32 %v812_v0, %v799_v32 }
 0x2a4   :  { %913 = vmatmul.bf16.vlgmr.msra.gmra.mxu3 %v829_v12  ;;  %v836_v53 = vpack.c.bf16 %v828_v48, %v827_v49  ;;  %v817_v3 = vadd.f32 %v812_v0, %v800_v39  ;;  %v818_v10 = vadd.f32 %v812_v0, %v801_v40  ;;  %v802_v20 = vmul.f32 %v795_v9, %v1941_v22 }
 0x2a5   :  { %v830_v54 = vpack.c.bf16 %v816_v34, %v815_v58  ;;  %v803_v38 = vmul.f32 %v795_v9, %v1947_v18  ;;  %v970_v6 = vlaneseq }
 0x2a6   :  { %v831_v44 = vpack.c.bf16 %v818_v10, %v817_v3  ;;  %v819_v45 = vadd.f32 %v812_v0, %v802_v20 }
 0x2a7   :  { %v820_v2 = vadd.f32 %v812_v0, %v803_v38  ;;  %v2027_v17 = vand.u32 127, %v970_v6 }
 0x2a9   :  { %v832_v41 = vpack.c.bf16 %v820_v2, %v819_v45  ;;  %vm972_vm7 = vcmp.lt.s32.totalorder %v2027_v17, 10 }
 0x2b4   :  { %918 = vmatmul.bf16.gmra.mxu3 %v830_v54 }
 0x2c4   :  { %923 = vmatmul.bf16.gmra.mxu3 %v831_v44 }
 0x2d4   :  { %928 = vmatmul.bf16.gmra.mxu3 %v832_v41 }
 0x2e4   :  { %933 = vmatmul.bf16.gmra.mxu3 %v833_v62 }
 0x2f4   :  { %938 = vmatmul.bf16.gmra.mxu3 %v834_v36 }
 0x304   :  { %943 = vmatmul.bf16.gmra.mxu3 %v835_v29 }
 0x314   :  { %948 = vmatmul.bf16.gmra.mxu3 %v836_v53 }
 0x327   :  { %v914_v46 = vpop.f32.mrf.mxu3 }
 0x328   :  { %v915_v22 = vadd.f32 %v2025_v11, %v914_v46 }
 0x32a   :  { %v954_v18 = vmax.f32 %v915_v22, 0.0 }
 0x32c   :  { %v2033_v55 = vsel %vm972_vm7, %v954_v18, -1e+30 }
 0x32d   :  { %989 = vmax.xlane.f32.xlu0 %v2033_v55 }
 0x32f   :  { %v916_v47 = vpop.f32.mrf.mxu3 }
 0x330   :  { %v917_v51 = vadd.f32 %v2025_v11, %v916_v47 }
 0x332   :  { %v955_v52 = vmax.f32 %v917_v51, 0.0 }
 0x334   :  { %v2039_v50 = vsel %vm972_vm7, %v955_v52, -1e+30 }
 0x335   :  { %991 = vmax.xlane.f32.xlu0 %v2039_v50 }
 0x337   :  { %v919_v61 = vpop.f32.mrf.mxu3 }
 0x338   :  { %v920_v56 = vadd.f32 %v2025_v11, %v919_v61 }
 0x33a   :  { %v956_v57 = vmax.f32 %v920_v56, 0.0 }
 0x33c   :  { %v2045_v59 = vsel %vm972_vm7, %v956_v57, -1e+30 }
 0x33d   :  { %993 = vmax.xlane.f32.xlu1 %v2045_v59 }
 0x33f   :  { %v921_v60 = vpop.f32.mrf.mxu3 }
 0x340   :  { %v922_v33 = vadd.f32 %v2025_v11, %v921_v60 }
 0x342   :  { %v957_v63 = vmax.f32 %v922_v33, 0.0 }
 0x344   :  { %v2051_v5 = vsel %vm972_vm7, %v957_v63, -1e+30 }
 0x345   :  { %995 = vmax.xlane.f32.xlu1 %v2051_v5 }
 0x347   :  { %v924_v7 = vpop.f32.mrf.mxu3 }
 0x348   :  { %v925_v8 = vadd.f32 %v2025_v11, %v924_v7 }
 0x34a   :  { %v958_v9 = vmax.f32 %v925_v8, 0.0 }
 0x34c   :  { %v2057_v13 = vsel %vm972_vm7, %v958_v9, -1e+30 }
 0x34d   :  { %997 = vmax.xlane.f32.xlu2 %v2057_v13 }
 0x34f   :  { %v926_v0 = vpop.f32.mrf.mxu3 }
 0x350   :  { %v927_v14 = vadd.f32 %v2025_v11, %v926_v0 }
 0x352   :  { %v959_v15 = vmax.f32 %v927_v14, 0.0 }
 0x354   :  { %v2063_v16 = vsel %vm972_vm7, %v959_v15, -1e+30 }
 0x355   :  { %999 = vmax.xlane.f32.xlu2 %v2063_v16 }
 0x357   :  { %v929_v19 = vpop.f32.mrf.mxu3 }
 0x358   :  { %v930_v21 = vadd.f32 %v2025_v11, %v929_v19 }
 0x35a   :  { %v960_v37 = vmax.f32 %v930_v21, 0.0 }
 0x35c   :  { %v2069_v35 = vsel %vm972_vm7, %v960_v37, -1e+30 }
 0x35d   :  { %1001 = vmax.xlane.f32.xlu0 %v2069_v35 }
 0x35f   :  { %v931_v23 = vpop.f32.mrf.mxu3 }
 0x360   :  { %v932_v25 = vadd.f32 %v2025_v11, %v931_v23 }
 0x362   :  { %v961_v12 = vmax.f32 %v932_v25, 0.0 }
 0x364   :  { %v2075_v24 = vsel %vm972_vm7, %v961_v12, -1e+30 }
 0x365   :  { %1003 = vmax.xlane.f32.xlu1 %v2075_v24 }
 0x367   :  { %v934_v26 = vpop.f32.mrf.mxu3 }
 0x368   :  { %v935_v31 = vadd.f32 %v2025_v11, %v934_v26 }
 0x36a   :  { %v962_v1 = vmax.f32 %v935_v31, 0.0 }
 0x36c   :  { %v2081_v4 = vsel %vm972_vm7, %v962_v1, -1e+30 }
 0x36d   :  { %1005 = vmax.xlane.f32.xlu2 %v2081_v4 }
 0x36f   :  { %v936_v62 = vpop.f32.mrf.mxu3 }
 0x370   :  { %v937_v27 = vadd.f32 %v2025_v11, %v936_v62 }
 0x372   :  { %v963_v28 = vmax.f32 %v937_v27, 0.0 }
 0x374   :  { %v2087_v42 = vsel %vm972_vm7, %v963_v28, -1e+30 }
 0x375   :  { %1007 = vmax.xlane.f32.xlu0 %v2087_v42 }
 0x377   :  { %v939_v36 = vpop.f32.mrf.mxu3 }
 0x378   :  { %v940_v43 = vadd.f32 %v2025_v11, %v939_v36 }
 0x37a   :  { %v964_v29 = vmax.f32 %v940_v43, 0.0 }
 0x37c   :  { %v2093_v49 = vsel %vm972_vm7, %v964_v29, -1e+30 }
 0x37d   :  { %1009 = vmax.xlane.f32.xlu1 %v2093_v49 }
 0x37f   :  { %v941_v48 = vpop.f32.mrf.mxu3 }
 0x380   :  { %v942_v53 = vadd.f32 %v2025_v11, %v941_v48 }
 0x382   :  { %v965_v30 = vmax.f32 %v942_v53, 0.0 }
 0x384   :  { %v2099_v32 = vsel %vm972_vm7, %v965_v30, -1e+30 }
 0x385   :  { %1011 = vmax.xlane.f32.xlu2 %v2099_v32 }
 0x387   :  { %v944_v58 = vpop.f32.mrf.mxu3 }
 0x388   :  { %v945_v34 = vadd.f32 %v2025_v11, %v944_v58 }
 0x38a   :  { %v966_v54 = vmax.f32 %v945_v34, 0.0 }
 0x38c   :  { %v2105_v39 = vsel %vm972_vm7, %v966_v54, -1e+30 }
 0x38d   :  { %1013 = vmax.xlane.f32.xlu0 %v2105_v39 }
 0x38f   :  { %v946_v40 = vpop.f32.mrf.mxu3 }
 0x390   :  { %v947_v3 = vadd.f32 %v2025_v11, %v946_v40 }
 0x392   :  { %v967_v10 = vmax.f32 %v947_v3, 0.0 }
 0x394   :  { %v2111_v44 = vsel %vm972_vm7, %v967_v10, -1e+30 }
 0x395   :  { %1015 = vmax.xlane.f32.xlu1 %v2111_v44 }
 0x397   :  { %v949_v20 = vpop.f32.mrf.mxu3 }
 0x398   :  { %v950_v38 = vadd.f32 %v2025_v11, %v949_v20 }
 0x39a   :  { %v968_v45 = vmax.f32 %v950_v38, 0.0 }
 0x39c   :  { %v2117_v2 = vsel %vm972_vm7, %v968_v45, -1e+30 }
 0x39d   :  { %1017 = vmax.xlane.f32.xlu2 %v2117_v2 }
 0x39f   :  { %v951_v41 = vpop.f32.mrf.mxu3 }
 0x3a0   :  { %v952_v6 = vadd.f32 %v2025_v11, %v951_v41  ;;  %v2121_v46 = vpop.xlane.xlu0 %989 }
 0x3a1   :  { %v1021_v22 = vsub.f32 %v2033_v55, %v2121_v46 }
 0x3a2   :  { %v969_v18 = vmax.f32 %v952_v6, 0.0 }
 0x3a3   :  { %v1037_v47 = vmul.f32 1.442695, %v1021_v22 }
 0x3a4   :  { %v2127_v51 = vsel %vm972_vm7, %v969_v18, -1e+30 }
 0x3a5   :  { %1464 = vpow2.f32 %v1037_v47  ;;  %1019 = vmax.xlane.f32.xlu0 %v2127_v51 }
 0x3a8   :  { %v2130_v52 = vpop.xlane.xlu0 %991 }
 0x3a9   :  { %v1022_v61 = vsub.f32 %v2039_v50, %v2130_v52 }
 0x3ab   :  { %v1465_v11 = vpop.eup %1464  ;;  %v1039_v56 = vmul.f32 1.442695, %v1022_v61 }
 0x3ac   :  { %1069 = vadd.xlane.f32.xlu1 %v1465_v11 }
 0x3ad   :  { %1466 = vpow2.f32 %v1039_v56 }
 0x3b0   :  { %v2134_v57 = vpop.xlane.xlu1 %993 }
 0x3b1   :  { %v1023_v60 = vsub.f32 %v2045_v59, %v2134_v57 }
 0x3b3   :  { %v1467_v17 = vpop.eup %1466  ;;  %v1041_v33 = vmul.f32 1.442695, %v1023_v60 }
 0x3b4   :  { %1071 = vadd.xlane.f32.xlu2 %v1467_v17 }
 0x3b5   :  { %1468 = vpow2.f32 %v1041_v33 }
 0x3b8   :  { %v2138_v63 = vpop.xlane.xlu1 %995 }
 0x3b9   :  { %v1024_v7 = vsub.f32 %v2051_v5, %v2138_v63 }
 0x3bb   :  { %v1469_v8 = vpop.eup %1468  ;;  %v1043_v9 = vmul.f32 1.442695, %v1024_v7 }
 0x3bc   :  { %1073 = vadd.xlane.f32.xlu0 %v1469_v8 }
 0x3bd   :  { %1470 = vpow2.f32 %v1043_v9 }
 0x3c0   :  { %v2142_v0 = vpop.xlane.xlu2 %997 }
 0x3c1   :  { %v1025_v14 = vsub.f32 %v2057_v13, %v2142_v0 }
 0x3c3   :  { %v1471_v15 = vpop.eup %1470  ;;  %v1045_v19 = vmul.f32 1.442695, %v1025_v14 }
 0x3c4   :  { %1075 = vadd.xlane.f32.xlu1 %v1471_v15 }
 0x3c5   :  { %1472 = vpow2.f32 %v1045_v19 }
 0x3c8   :  { %v2146_v21 = vpop.xlane.xlu2 %999 }
 0x3c9   :  { %v1026_v37 = vsub.f32 %v2063_v16, %v2146_v21 }
 0x3cb   :  { %v1473_v23 = vpop.eup %1472  ;;  %v1047_v25 = vmul.f32 1.442695, %v1026_v37 }
 0x3cc   :  { %1077 = vadd.xlane.f32.xlu2 %v1473_v23 }
 0x3cd   :  { %1474 = vpow2.f32 %v1047_v25 }
 0x3d0   :  { %v2150_v12 = vpop.xlane.xlu0 %1001 }
 0x3d1   :  { %v1027_v26 = vsub.f32 %v2069_v35, %v2150_v12 }
 0x3d3   :  { %v1475_v31 = vpop.eup %1474  ;;  %v1049_v1 = vmul.f32 1.442695, %v1027_v26 }
 0x3d4   :  { %1079 = vadd.xlane.f32.xlu0 %v1475_v31 }
 0x3d5   :  { %1476 = vpow2.f32 %v1049_v1 }
 0x3d8   :  { %v2154_v62 = vpop.xlane.xlu1 %1003 }
 0x3d9   :  { %v1028_v27 = vsub.f32 %v2075_v24, %v2154_v62 }
 0x3db   :  { %v1477_v28 = vpop.eup %1476  ;;  %v1051_v36 = vmul.f32 1.442695, %v1028_v27 }
 0x3dc   :  { %1081 = vadd.xlane.f32.xlu1 %v1477_v28 }
 0x3dd   :  { %1478 = vpow2.f32 %v1051_v36 }
 0x3e0   :  { %v2158_v43 = vpop.xlane.xlu2 %1005 }
 0x3e1   :  { %v1029_v29 = vsub.f32 %v2081_v4, %v2158_v43 }
 0x3e3   :  { %v1479_v48 = vpop.eup %1478  ;;  %v1053_v53 = vmul.f32 1.442695, %v1029_v29 }
 0x3e4   :  { %1083 = vadd.xlane.f32.xlu2 %v1479_v48 }
 0x3e5   :  { %1480 = vpow2.f32 %v1053_v53 }
 0x3e8   :  { %v2162_v30 = vpop.xlane.xlu0 %1007 }
 0x3e9   :  { %v1030_v58 = vsub.f32 %v2087_v42, %v2162_v30 }
 0x3eb   :  { %v1481_v34 = vpop.eup %1480  ;;  %v1055_v54 = vmul.f32 1.442695, %v1030_v58 }
 0x3ec   :  { %1085 = vadd.xlane.f32.xlu0 %v1481_v34 }
 0x3ed   :  { %1482 = vpow2.f32 %v1055_v54 }
 0x3f0   :  { %v2166_v40 = vpop.xlane.xlu1 %1009 }
 0x3f1   :  { %v1031_v3 = vsub.f32 %v2093_v49, %v2166_v40 }
 0x3f3   :  { %v1483_v10 = vpop.eup %1482  ;;  %v1057_v20 = vmul.f32 1.442695, %v1031_v3 }
 0x3f4   :  { %1087 = vadd.xlane.f32.xlu1 %v1483_v10 }
 0x3f5   :  { %1484 = vpow2.f32 %v1057_v20 }
 0x3f8   :  { %v2170_v38 = vpop.xlane.xlu2 %1011 }
 0x3f9   :  { %v1032_v45 = vsub.f32 %v2099_v32, %v2170_v38 }
 0x3fb   :  { %v1485_v41 = vpop.eup %1484  ;;  %v1059_v6 = vmul.f32 1.442695, %v1032_v45 }
 0x3fc   :  { %1089 = vadd.xlane.f32.xlu2 %v1485_v41 }
 0x3fd   :  { %1486 = vpow2.f32 %v1059_v6 }
 0x400   :  { %v2174_v22 = vpop.xlane.xlu0 %1013 }
 0x401   :  { %v1033_v18 = vsub.f32 %v2105_v39, %v2174_v22 }
 0x403   :  { %v1487_v47 = vpop.eup %1486  ;;  %v1061_v61 = vmul.f32 1.442695, %v1033_v18 }
 0x404   :  { %1091 = vadd.xlane.f32.xlu0 %v1487_v47 }
 0x405   :  { %1488 = vpow2.f32 %v1061_v61 }
 0x408   :  { %v2178_v11 = vpop.xlane.xlu1 %1015 }
 0x409   :  { %v1034_v56 = vsub.f32 %v2111_v44, %v2178_v11 }
 0x40b   :  { %v1489_v60 = vpop.eup %1488  ;;  %v1063_v17 = vmul.f32 1.442695, %v1034_v56 }
 0x40c   :  { %1093 = vadd.xlane.f32.xlu1 %v1489_v60 }
 0x40d   :  { %1490 = vpow2.f32 %v1063_v17 }
 0x410   :  { %v2182_v33 = vpop.xlane.xlu2 %1017 }
 0x411   :  { %v1035_v7 = vsub.f32 %v2117_v2, %v2182_v33 }
 0x413   :  { %v1491_v8 = vpop.eup %1490  ;;  %v1065_v9 = vmul.f32 1.442695, %v1035_v7 }
 0x414   :  { %1095 = vadd.xlane.f32.xlu2 %v1491_v8 }
 0x415   :  { %1492 = vpow2.f32 %v1065_v9 }
 0x418   :  { %v2186_v14 = vpop.xlane.xlu0 %1019 }
 0x419   :  { %v1036_v15 = vsub.f32 %v2127_v51, %v2186_v14 }
 0x41b   :  { %v1493_v19 = vpop.eup %1492  ;;  %v1067_v37 = vmul.f32 1.442695, %v1036_v15 }
 0x41c   :  { %1097 = vadd.xlane.f32.xlu0 %v1493_v19 }
 0x41d   :  { %1494 = vpow2.f32 %v1067_v37 }
 0x41f   :  { %v1070_v23 = vpop.xlane.xlu1 %1069 }
 0x420   :  { %1496 = vlog2.f32 %v1070_v23 }
 0x423   :  { %v1495_v25 = vpop.eup %1494 }
 0x424   :  { %1099 = vadd.xlane.f32.xlu1 %v1495_v25 }
 0x426   :  { %v1497_v26 = vpop.eup %1496 }
 0x427   :  { %v1102_v31 = vmul.f32 0.6931472, %v1497_v26  ;;  %v1072_v1 = vpop.xlane.xlu2 %1071 }
 0x428   :  { %1498 = vlog2.f32 %v1072_v1 }
 0x429   :  { %v1133_v27 = vadd.f32 %v1102_v31, %v2121_v46 }
 0x42b   :  { %v1149_v28 = vsub.f32 %v2033_v55, %v1133_v27 }
 0x42d   :  { %1165 = vst [vmem:[#allocation13] sm:$0xff] %v1149_v28 }
 0x42e   :  { %v1499_v36 = vpop.eup %1498 }
 0x42f   :  { %v1104_v29 = vmul.f32 0.6931472, %v1499_v36  ;;  %v1074_v48 = vpop.xlane.xlu0 %1073 }
 0x430   :  { %1500 = vlog2.f32 %v1074_v48 }
 0x431   :  { %v1134_v53 = vadd.f32 %v1104_v29, %v2130_v52 }
 0x433   :  { %v1150_v58 = vsub.f32 %v2039_v50, %v1134_v53 }
 0x435   :  { %1166 = vst [vmem:[#allocation13 + $0x8] sm:$0xff] %v1150_v58 }
 0x436   :  { %v1501_v34 = vpop.eup %1500 }
 0x437   :  { %v1106_v54 = vmul.f32 0.6931472, %v1501_v34  ;;  %v1076_v3 = vpop.xlane.xlu1 %1075 }
 0x438   :  { %1502 = vlog2.f32 %v1076_v3 }
 0x439   :  { %v1135_v10 = vadd.f32 %v1106_v54, %v2134_v57 }
 0x43b   :  { %v1151_v46 = vsub.f32 %v2045_v59, %v1135_v10 }
 0x43d   :  { %1167 = vst [vmem:[#allocation13 + $0x10] sm:$0xff] %v1151_v46 }
 0x43e   :  { %v1503_v55 = vpop.eup %1502 }
 0x43f   :  { %v1108_v20 = vmul.f32 0.6931472, %v1503_v55  ;;  %v1078_v45 = vpop.xlane.xlu2 %1077 }
 0x440   :  { %1504 = vlog2.f32 %v1078_v45 }
 0x441   :  { %v1136_v41 = vadd.f32 %v1108_v20, %v2138_v63 }
 0x443   :  { %v1152_v52 = vsub.f32 %v2051_v5, %v1136_v41 }
 0x445   :  { %1168 = vst [vmem:[#allocation13 + $0x18] sm:$0xff] %v1152_v52 }
 0x446   :  { %v1505_v50 = vpop.eup %1504 }
 0x447   :  { %v1110_v6 = vmul.f32 0.6931472, %v1505_v50  ;;  %v1080_v18 = vpop.xlane.xlu0 %1079 }
 0x448   :  { %1506 = vlog2.f32 %v1080_v18 }
 0x449   :  { %v1137_v47 = vadd.f32 %v1110_v6, %v2142_v0 }
 0x44b   :  { %v1153_v57 = vsub.f32 %v2057_v13, %v1137_v47 }
 0x44d   :  { %1169 = vst [vmem:[#allocation13 + $0x20] sm:$0xff] %v1153_v57 }
 0x44e   :  { %v1507_v59 = vpop.eup %1506 }
 0x44f   :  { %v1112_v61 = vmul.f32 0.6931472, %v1507_v59  ;;  %v1082_v56 = vpop.xlane.xlu1 %1081 }
 0x450   :  { %1508 = vlog2.f32 %v1082_v56 }
 0x451   :  { %v1138_v60 = vadd.f32 %v1112_v61, %v2146_v21 }
 0x453   :  { %v1154_v63 = vsub.f32 %v2063_v16, %v1138_v60 }
 0x455   :  { %1170 = vst [vmem:[#allocation13 + $0x28] sm:$0xff] %v1154_v63 }
 0x456   :  { %v1509_v5 = vpop.eup %1508 }
 0x457   :  { %v1114_v17 = vmul.f32 0.6931472, %v1509_v5  ;;  %v1084_v7 = vpop.xlane.xlu2 %1083 }
 0x458   :  { %1510 = vlog2.f32 %v1084_v7 }
 0x459   :  { %v1139_v8 = vadd.f32 %v1114_v17, %v2150_v12 }
 0x45b   :  { %v1155_v0 = vsub.f32 %v2069_v35, %v1139_v8 }
 0x45d   :  { %1171 = vst [vmem:[#allocation13 + $0x30] sm:$0xff] %v1155_v0 }
 0x45e   :  { %v1511_v13 = vpop.eup %1510 }
 0x45f   :  { %v1116_v9 = vmul.f32 0.6931472, %v1511_v13  ;;  %v1086_v15 = vpop.xlane.xlu0 %1085 }
 0x460   :  { %1512 = vlog2.f32 %v1086_v15 }
 0x461   :  { %v1140_v19 = vadd.f32 %v1116_v9, %v2154_v62 }
 0x463   :  { %v1156_v21 = vsub.f32 %v2075_v24, %v1140_v19 }
 0x465   :  { %1172 = vst [vmem:[#allocation13 + $0x38] sm:$0xff] %v1156_v21 }
 0x466   :  { %v1513_v16 = vpop.eup %1512 }
 0x467   :  { %v1118_v37 = vmul.f32 0.6931472, %v1513_v16  ;;  %v1088_v23 = vpop.xlane.xlu1 %1087 }
 0x468   :  { %1514 = vlog2.f32 %v1088_v23 }
 0x469   :  { %v1141_v25 = vadd.f32 %v1118_v37, %v2158_v43 }
 0x46b   :  { %v1157_v12 = vsub.f32 %v2081_v4, %v1141_v25 }
 0x46d   :  { %1173 = vst [vmem:[#allocation13 + $0x40] sm:$0xff] %v1157_v12 }
 0x46e   :  { %v1515_v35 = vpop.eup %1514 }
 0x46f   :  { %v1120_v26 = vmul.f32 0.6931472, %v1515_v35  ;;  %v1090_v31 = vpop.xlane.xlu2 %1089 }
 0x470   :  { %1516 = vlog2.f32 %v1090_v31 }
 0x471   :  { %v1142_v1 = vadd.f32 %v1120_v26, %v2162_v30 }
 0x473   :  { %v1158_v62 = vsub.f32 %v2087_v42, %v1142_v1 }
 0x475   :  { %1174 = vst [vmem:[#allocation13 + $0x48] sm:$0xff] %v1158_v62 }
 0x476   :  { %v1517_v24 = vpop.eup %1516 }
 0x477   :  { %v1122_v27 = vmul.f32 0.6931472, %v1517_v24  ;;  %v1092_v28 = vpop.xlane.xlu0 %1091 }
 0x478   :  { %1518 = vlog2.f32 %v1092_v28 }
 0x479   :  { %v1143_v36 = vadd.f32 %v1122_v27, %v2166_v40 }
 0x47b   :  { %v1159_v43 = vsub.f32 %v2093_v49, %v1143_v36 }
 0x47d   :  { %1175 = vst [vmem:[#allocation13 + $0x50] sm:$0xff] %v1159_v43 }
 0x47e   :  { %v1519_v4 = vpop.eup %1518 }
 0x47f   :  { %v1124_v29 = vmul.f32 0.6931472, %v1519_v4  ;;  %v1094_v48 = vpop.xlane.xlu1 %1093 }
 0x480   :  { %1520 = vlog2.f32 %v1094_v48 }
 0x481   :  { %v1144_v53 = vadd.f32 %v1124_v29, %v2170_v38 }
 0x483   :  { %v1160_v30 = vsub.f32 %v2099_v32, %v1144_v53 }
 0x485   :  { %1176 = vst [vmem:[#allocation13 + $0x58] sm:$0xff] %v1160_v30 }
 0x486   :  { %v1521_v42 = vpop.eup %1520 }
 0x487   :  { %v1126_v58 = vmul.f32 0.6931472, %v1521_v42  ;;  %v1096_v34 = vpop.xlane.xlu2 %1095 }
 0x488   :  { %1522 = vlog2.f32 %v1096_v34 }
 0x489   :  { %v1145_v54 = vadd.f32 %v1126_v58, %v2174_v22 }
 0x48b   :  { %v1161_v40 = vsub.f32 %v2105_v39, %v1145_v54 }
 0x48d   :  { %1177 = vst [vmem:[#allocation13 + $0x60] sm:$0xff] %v1161_v40 }
 0x48e   :  { %v1523_v49 = vpop.eup %1522 }
 0x48f   :  { %v1128_v3 = vmul.f32 0.6931472, %v1523_v49  ;;  %v1098_v10 = vpop.xlane.xlu0 %1097 }
 0x490   :  { %1524 = vlog2.f32 %v1098_v10 }
 0x491   :  { %v1146_v46 = vadd.f32 %v1128_v3, %v2178_v11 }
 0x493   :  { %v1162_v38 = vsub.f32 %v2111_v44, %v1146_v46 }
 0x495   :  { %1178 = vst [vmem:[#allocation13 + $0x68] sm:$0xff] %v1162_v38 }
 0x496   :  { %v1525_v32 = vpop.eup %1524 }
 0x497   :  { %v1130_v55 = vmul.f32 0.6931472, %v1525_v32  ;;  %v1100_v20 = vpop.xlane.xlu1 %1099 }
 0x498   :  { %1526 = vlog2.f32 %v1100_v20 }
 0x499   :  { %v1147_v45 = vadd.f32 %v1130_v55, %v2182_v33 }
 0x49b   :  { %v1163_v22 = vsub.f32 %v2117_v2, %v1147_v45 }
 0x49d   :  { %1179 = vst [vmem:[#allocation13 + $0x70] sm:$0xff] %v1163_v22 }
 0x49e   :  { %v1527_v39 = vpop.eup %1526 }
 0x49f   :  { %v1132_v41 = vmul.f32 0.6931472, %v1527_v39 }
 0x4a1   :  { %v1148_v44 = vadd.f32 %v1132_v41, %v2186_v14 }
 0x4a3   :  { %v1164_v11 = vsub.f32 %v2127_v51, %v1148_v44 }
 0x4a5   :  { %1180 = vst [vmem:[#allocation13 + $0x78] sm:$0xff] %v1164_v11 }
 0x4a6   :  { %1193 = dma.vmem_to_hbm [thread:$0]  %s1186_s8, 2048, %s1188_s11, [#allocation4], %s1711_s19, %s1711_s19, %s1712_s20  }
 0x4a7   :  { %1704 = dma.done.wait [#allocation4], 2048  }
 0x4a8   :  { %1705 = vsyncadd [#allocation4], 4294965248 }
 0x4a9   :  { %1198 = vsyncpa [#allocation3], 1 }
 0x4aa   :  { %1199 = vsyncpa [#allocation6], 1 }
 0x4ab   :  { %1200 = vsyncpa [#allocation9], 1 }
 0x4ac   :  { %1201 = vsyncpa [#allocation12], 1 }
 0x4ad   :  { %1202 = vsyncpa [#allocation4], 1 }

</bundles_post_ra>
